<compile_context>
chip_gen: v7x
topology: tpu7x:2x2x1
jax: 0.10.0
libtpu: 0.0.40
codegen_flags: <defaults>
</compile_context>

<pallas_src>
import numpy as np
import jax
import jax.numpy as jnp
from jax import lax
from jax.experimental import pallas as pl
from jax.experimental.pallas import tpu as pltpu

# ---------------- hyper-parameters (small, consistent with the module) -------
N_BANDS     = 8
N_FEATURES  = 16
N_CHANNELS  = 8
N_SAMPLES   = 64
N_CLASSES   = 4
BAND_KERNEL = 9
POOL_KERNEL = 2

COS_EPS = 1e-8          # DTN eps (cosine similarity)
IN_EPS  = 1e-5          # InstanceNorm2d default eps
BN_EPS  = 1e-5          # BatchNorm2d default eps

S2       = N_SAMPLES // POOL_KERNEL           # 32 (post-stride-2 length)
PAD_L    = (BAND_KERNEL - 1) // 2             # 4
PAD_R    = BAND_KERNEL - 1 - PAD_L            # 4
J_TAPS   = POOL_KERNEL + BAND_KERNEL - 1      # 10 front-end taps (j = p + k)
Q_TAPS   = J_TAPS // POOL_KERNEL              # 5 even/odd shift groups
HALF_PAD = PAD_L // POOL_KERNEL               # 2 (pad in even/odd index space)

TB = 8                                        # samples per grid step -> 256 lanes


# ------------------------------ Pallas kernel --------------------------------
def dtn_kernel(xe_ref, xo_ref, weff_ref, wt2_ref, bnsh_ref, m1_ref, m2_ref,
               segb_ref, segbt_ref, ttile_ref, tninv_ref, fcw_ref, fcb_ref,
               o_ref):
    C, S, F, NC = N_CHANNELS, N_SAMPLES, N_FEATURES, N_CLASSES
    L = xe_ref.shape[-1]                      # TB * S2 merged (sample, time) lanes

    xe = xe_ref[...]                          # (C, L) raw even-indexed samples
    xo = xo_ref[...]                          # (C, L) raw odd-indexed samples

    # --- InstanceNorm2d(1): per-sample mean/var via lane-segment matmuls -----
    col_s  = jnp.sum(xe + xo, axis=0, keepdims=True)              # (1, L)
    col_s2 = jnp.sum(xe * xe + xo * xo, axis=0, keepdims=True)    # (1, L)
    sums = jnp.dot(jnp.concatenate([col_s, col_s2], axis=0), segbt_ref[...],
                   preferred_element_type=jnp.float32)            # (2, TB)
    inv_n = 1.0 / (C * S)
    mean = sums[0:1] * inv_n                                      # (1, TB)
    var  = jnp.maximum(sums[1:2] * inv_n - mean * mean, 0.0)
    istd = lax.rsqrt(var + IN_EPS)                                # (1, TB)
    bc = jnp.dot(jnp.concatenate([mean, istd], axis=0), segb_ref[...],
                 preferred_element_type=jnp.float32)              # (2, L)
    xen = (xe - bc[0:1]) * bc[1:2]                                # normalized even
    xon = (xo - bc[0:1]) * bc[1:2]                                # normalized odd

    # --- fused band ∘ spatial ∘ temporal1(stride 2) ∘ BN-scale front end -----
    #     pre[f, b*S2+t] = sum_{c,j} W_eff[f, j*C+c] * xpad_norm[b, c, 2t+j]
    zc = jnp.zeros((C, HALF_PAD), jnp.float32)
    xep = jnp.concatenate([zc, xen, zc], axis=-1)                 # (C, L+4)
    xop = jnp.concatenate([zc, xon, zc], axis=-1)
    pieces = []
    for q in range(Q_TAPS):
        mq = m1_ref[q:q + 1, :]                                   # (1, L) seg mask
        pieces.append(xep[:, q:q + L] * mq)                       # tap j = 2q
        pieces.append(xop[:, q:q + L] * mq)                       # tap j = 2q + 1
    patch1 = jnp.concatenate(pieces, axis=0)                      # (J*C=80, L)
    pre = jnp.dot(weff_ref[...], patch1,
                  preferred_element_type=jnp.float32)             # (F, L)
    feat2 = jnp.tanh(pre + bnsh_ref[...])                         # (F, L)

    # --- temporal_layer2 (1, 9), same padding: one (F,144)@(144,L) matmul ----
    zf = jnp.zeros((F, PAD_L), jnp.float32)
    f2p = jnp.concatenate([zf, feat2, zf], axis=-1)               # (F, L+8)
    pieces2 = [f2p[:, k:k + L] * m2_ref[k:k + 1, :]
               for k in range(BAND_KERNEL)]
    patch2 = jnp.concatenate(pieces2, axis=0)                     # (K*F=144, L)
    feat3 = jnp.dot(wt2_ref[...], patch2,
                    preferred_element_type=jnp.float32)           # (F, L)

    # --- cosine similarity vs templates + FC, batched over the TB block ------
    f3rep = jnp.concatenate([feat3] * NC, axis=0)                 # (NC*F, L)
    red_lhs = jnp.concatenate([f3rep * ttile_ref[...], feat3 * feat3], axis=0)
    red = jnp.dot(red_lhs, segbt_ref[...],
                  preferred_element_type=jnp.float32)             # (NC*F+F, TB)
    num = red[:NC * F, :]                                         # (64, TB)
    fn2 = red[NC * F:, :]                                         # (16, TB)
    finv = lax.rsqrt(jnp.maximum(fn2, COS_EPS * COS_EPS))         # 1/max(|f|,eps)
    cos = num * tninv_ref[...] * jnp.concatenate([finv] * NC, axis=0)  # (64, TB)

    logits = jnp.dot(fcw_ref[...], cos,
                     preferred_element_type=jnp.float32) + fcb_ref[...]  # (NC, TB)
    o_ref[0] = logits


# ------------------------------ wrapper ---------------------------------------
def _const_spec(shape):
    n = len(shape)
    return pl.BlockSpec(shape, lambda i, n=n: (0,) * n)


def _block_constants(tb):
    """TB-dependent 0/1 mask / segment-selection constants (numpy, baked in)."""
    L = tb * S2
    t = np.arange(S2)
    m1 = np.stack([np.tile(((t + q - HALF_PAD >= 0) &
                            (t + q - HALF_PAD <= S2 - 1)).astype(np.float32), tb)
                   for q in range(Q_TAPS)], axis=0)                      # (5, L)
    m2 = np.stack([np.tile(((t + k - PAD_L >= 0) &
                            (t + k - PAD_L <= S2 - 1)).astype(np.float32), tb)
                   for k in range(BAND_KERNEL)], axis=0)                 # (9, L)
    segb = np.kron(np.eye(tb, dtype=np.float32),
                   np.ones((1, S2), np.float32))                         # (tb, L)
    segbT = np.ascontiguousarray(segb.T)                                 # (L, tb)
    return m1, m2, segb, segbT


def dtn_forward(x, kernel_params, tb=TB):
    weff, wt2f, bnsh, tmpl, tninv64, fcw_t, fcb_col = kernel_params
    B, C, S = x.shape
    nblk = max(1, (B + tb - 1) // tb)
    Bp = nblk * tb
    L = tb * S2
    if Bp != B:
        x = jnp.concatenate([x, jnp.zeros((Bp - B, C, S), x.dtype)], axis=0)

    # Host-side layout plumbing only: even/odd deinterleave + merged-lane view.
    xr = x.reshape(Bp, C, S2, POOL_KERNEL)
    xe = jnp.transpose(xr[..., 0], (1, 0, 2)).reshape(C, Bp * S2)
    xo = jnp.transpose(xr[..., 1], (1, 0, 2)).reshape(C, Bp * S2)

    m1, m2, segb, segbT = _block_constants(tb)
    ttile = jnp.tile(tmpl.reshape(N_CLASSES * N_FEATURES, S2), (1, tb))

    consts = (weff, wt2f, bnsh, jnp.asarray(m1), jnp.asarray(m2),
              jnp.asarray(segb), jnp.asarray(segbT), ttile, tninv64,
              fcw_t, fcb_col)

    out = pl.pallas_call(
        dtn_kernel,
        out_shape=jax.ShapeDtypeStruct((nblk, N_CLASSES, tb), jnp.float32),
        grid=(nblk,),
        in_specs=[pl.BlockSpec((C, L), lambda i: (0, i)),
                  pl.BlockSpec((C, L), lambda i: (0, i))]
                 + [_const_spec(a.shape) for a in consts],
        out_specs=pl.BlockSpec((1, N_CLASSES, tb), lambda i: (i, 0, 0)),
        compiler_params=pltpu.CompilerParams(
            dimension_semantics=("parallel",)),
    )(xe, xo, *consts)

    # lane-dense (NC, TB) blocks -> (B, NC)
    return out.transpose(0, 2, 1).reshape(Bp, N_CLASSES)[:B]


# ------------------------------ params ----------------------------------------
def init_params(key):
    ks = jax.random.split(key, 11)
    wband = 0.3 * jax.random.normal(ks[0], (N_BANDS, BAND_KERNEL), jnp.float32)
    wsp3 = 0.2 * jax.random.normal(
        ks[1], (N_FEATURES, N_BANDS, N_CHANNELS), jnp.float32)
    # MaxNormConstraintConv2d(max_norm_value=1): project each filter to L2<=1
    norms = jnp.sqrt(jnp.sum(wsp3 ** 2, axis=(1, 2), keepdims=True))
    wsp3 = wsp3 * jnp.minimum(1.0, 1.0 / jnp.maximum(norms, 1e-12))
    wt1_3 = 0.2 * jax.random.normal(
        ks[2], (N_FEATURES, N_FEATURES, POOL_KERNEL), jnp.float32)
    wt2_3 = 0.1 * jax.random.normal(
        ks[3], (N_FEATURES, N_FEATURES, BAND_KERNEL), jnp.float32)
    gamma = 0.5 + jax.random.uniform(ks[4], (N_FEATURES,), jnp.float32)
    beta  = 0.1 * jax.random.normal(ks[5], (N_FEATURES,), jnp.float32)
    rmean = 0.1 * jax.random.normal(ks[6], (N_FEATURES,), jnp.float32)
    rvar  = 0.5 + jax.random.uniform(ks[7], (N_FEATURES,), jnp.float32)
    tmpl = 0.2 * jax.random.normal(
        ks[8], (N_CLASSES, N_FEATURES, S2), jnp.float32)
    fcw = 0.1 * jax.random.normal(
        ks[9], (N_CLASSES * N_FEATURES, N_CLASSES), jnp.float32)
    fcb = 0.1 * jax.random.normal(ks[10], (1, N_CLASSES), jnp.float32)

    raw = (wband, wsp3, wt1_3, wt2_3, gamma, beta, rmean, rvar, tmpl, fcw, fcb)

    # ---- host-side algebraic folds (exact: no nonlinearity in between) ------
    bn_scale = gamma / jnp.sqrt(rvar + BN_EPS)                       # (F,)
    bn_shift = (beta - rmean * bn_scale)[:, None]                    # (F, 1)

    # band (1,K) ∘ spatial (C,1): W_bs[f', c, k] = sum_nb wsp[f',nb,c]*wband[nb,k]
    w_bs = jnp.einsum('fnc,nk->fck', wsp3, wband)                    # (F, C, K)
    # temporal1 (1,P)/stride P with the eval-BN scale folded in
    wt1_bn = wt1_3 * bn_scale[:, None, None]                         # (F, F, P)
    w_eff = jnp.zeros((N_FEATURES, N_CHANNELS, J_TAPS), jnp.float32)
    for p in range(POOL_KERNEL):
        w_eff = w_eff.at[:, :, p:p + BAND_KERNEL].add(
            jnp.einsum('fg,gck->fck', wt1_bn[:, :, p], w_bs))
    # kernel patch-row ordering is j*C + c
    weff_flat = jnp.transpose(w_eff, (0, 2, 1)).reshape(
        N_FEATURES, J_TAPS * N_CHANNELS)                             # (16, 80)

    # temporal2 stacked as (F, K*F); patch-row ordering k*F + f'
    wt2_flat = jnp.transpose(wt2_3, (0, 2, 1)).reshape(
        N_FEATURES, BAND_KERNEL * N_FEATURES)                        # (16, 144)

    # template inverse norms (batch-invariant), row order nc*F + f
    tninv64 = (1.0 / jnp.maximum(
        jnp.sqrt(jnp.sum(tmpl * tmpl, axis=-1)), COS_EPS)
               ).reshape(N_CLASSES * N_FEATURES, 1)                  # (64, 1)

    fcw_t = jnp.transpose(fcw)                                       # (NC, NC*F)
    fcb_col = fcb.reshape(N_CLASSES, 1)                              # (NC, 1)

    kernel_params = (weff_flat, wt2_flat, bn_shift, tmpl, tninv64,
                     fcw_t, fcb_col)
    return raw, kernel_params


# ------------------------------ pure-JAX reference -----------------------------
def dtn_reference(x, raw):
    wband, wsp3, wt1_3, wt2_3, gamma, beta, rmean, rvar, tmpl, fcw, fcb = raw
    B = x.shape[0]
    dn = ("NCHW", "OIHW", "NCHW")
    hp = lax.Precision.HIGHEST
    xi = x[:, None, :, :]
    m = jnp.mean(xi, axis=(2, 3), keepdims=True)
    v = jnp.mean((xi - m) ** 2, axis=(2, 3), keepdims=True)
    xn = (xi - m) / jnp.sqrt(v + IN_EPS)
    xp = jnp.pad(xn, ((0, 0), (0, 0), (0, 0), (PAD_L, PAD_R)))
    band = lax.conv_general_dilated(xp, wband[:, None, None, :], (1, 1), "VALID",
                                    dimension_numbers=dn, precision=hp)
    feat1 = lax.conv_general_dilated(band, wsp3[:, :, :, None], (1, 1), "VALID",
                                     dimension_numbers=dn, precision=hp)
    feat2 = lax.conv_general_dilated(feat1, wt1_3[:, :, None, :],
                                     (1, POOL_KERNEL), "VALID",
                                     dimension_numbers=dn, precision=hp)
    scale = (gamma / jnp.sqrt(rvar + BN_EPS))[None, :, None, None]
    shift = (beta - rmean * gamma / jnp.sqrt(rvar + BN_EPS))[None, :, None, None]
    feat2 = jnp.tanh(feat2 * scale + shift)
    f2p = jnp.pad(feat2, ((0, 0), (0, 0), (0, 0), (PAD_L, PAD_R)))
    feat3 = lax.conv_general_dilated(f2p, wt2_3[:, :, None, :], (1, 1), "VALID",
                                     dimension_numbers=dn, precision=hp)
    out = feat3.reshape(B, 1, N_FEATURES, S2)
    T = tmpl.reshape(1, N_CLASSES, N_FEATURES, S2)
    num = jnp.sum(out * T, axis=-1)
    n1 = jnp.maximum(jnp.sqrt(jnp.sum(out * out, axis=-1)), COS_EPS)
    n2 = jnp.maximum(jnp.sqrt(jnp.sum(T * T, axis=-1)), COS_EPS)
    cos = num / (n1 * n2)                          # (B, NC, F)
    flat = cos.reshape(B, -1)
    return jnp.dot(flat, fcw, precision=hp) + fcb


# ------------------------------ main -------------------------------------------
if __name__ == "__main__":
    key = jax.random.PRNGKey(0)
    kx, kp = jax.random.split(key)
    B = 16   # 2 grid blocks of TB=8 -> both v7x TensorCores get work
    x = jax.random.normal(kx, (B, N_CHANNELS, N_SAMPLES), jnp.float32)
    raw, kernel_params = init_params(kp)

    out = jax.jit(dtn_forward)(x, kernel_params)
    out = jax.block_until_ready(out)

    ref = dtn_reference(x, raw)
    assert out.shape == (B, N_CLASSES)
    np.testing.assert_allclose(np.asarray(out), np.asarray(ref),
                               rtol=2e-2, atol=2e-2)
    print("KERNEL_OK")
</pallas_src>

<mosaic_0001>
module attributes {stable_mosaic.version = 11 : i64} {
  func.func @dtn_kernel(%arg0: i32, %arg1: memref<8x256xf32, #tpu.memory_space<vmem>>, %arg2: memref<8x256xf32, #tpu.memory_space<vmem>>, %arg3: memref<16x80xf32, #tpu.memory_space<vmem>>, %arg4: memref<16x144xf32, #tpu.memory_space<vmem>>, %arg5: memref<16x1xf32, #tpu.memory_space<vmem>>, %arg6: memref<5x256xf32, #tpu.memory_space<vmem>>, %arg7: memref<9x256xf32, #tpu.memory_space<vmem>>, %arg8: memref<8x256xf32, #tpu.memory_space<vmem>>, %arg9: memref<256x8xf32, #tpu.memory_space<vmem>>, %arg10: memref<64x256xf32, #tpu.memory_space<vmem>>, %arg11: memref<64x1xf32, #tpu.memory_space<vmem>>, %arg12: memref<4x64xf32, #tpu.memory_space<vmem>>, %arg13: memref<4x1xf32, #tpu.memory_space<vmem>>, %arg14: memref<1x4x8xf32, #tpu.memory_space<vmem>>) attributes {dimension_semantics = [#tpu.dimension_semantics<parallel>], iteration_bounds = array<i64: 2>, scalar_prefetch = 0 : i64, scratch_operands = 0 : i64, tpu.core_type = #tpu.core_type<tc>, window_params = [{transform_indices = @transform_0, window_bounds = array<i64: 8, 256>}, {transform_indices = @transform_1, window_bounds = array<i64: 8, 256>}, {pipeline_mode = #tpu.pipeline_mode<synchronous>, transform_indices = @transform_2, window_bounds = array<i64: 16, 80>}, {pipeline_mode = #tpu.pipeline_mode<synchronous>, transform_indices = @transform_3, window_bounds = array<i64: 16, 144>}, {pipeline_mode = #tpu.pipeline_mode<synchronous>, transform_indices = @transform_4, window_bounds = array<i64: 16, 1>}, {pipeline_mode = #tpu.pipeline_mode<synchronous>, transform_indices = @transform_5, window_bounds = array<i64: 5, 256>}, {pipeline_mode = #tpu.pipeline_mode<synchronous>, transform_indices = @transform_6, window_bounds = array<i64: 9, 256>}, {pipeline_mode = #tpu.pipeline_mode<synchronous>, transform_indices = @transform_7, window_bounds = array<i64: 8, 256>}, {pipeline_mode = #tpu.pipeline_mode<synchronous>, transform_indices = @transform_8, window_bounds = array<i64: 256, 8>}, {pipeline_mode = #tpu.pipeline_mode<synchronous>, transform_indices = @transform_9, window_bounds = array<i64: 64, 256>}, {pipeline_mode = #tpu.pipeline_mode<synchronous>, transform_indices = @transform_10, window_bounds = array<i64: 64, 1>}, {pipeline_mode = #tpu.pipeline_mode<synchronous>, transform_indices = @transform_11, window_bounds = array<i64: 4, 64>}, {pipeline_mode = #tpu.pipeline_mode<synchronous>, transform_indices = @transform_12, window_bounds = array<i64: 4, 1>}, {transform_indices = @transform_13, window_bounds = array<i64: 1, 4, 8>}]} {
    %c0 = arith.constant 0 : index
    %c0_0 = arith.constant 0 : index
    %0 = vector.load %arg1[%c0, %c0_0] : memref<8x256xf32, #tpu.memory_space<vmem>>, vector<8x256xf32>
    %c0_1 = arith.constant 0 : index
    %c0_2 = arith.constant 0 : index
    %1 = vector.load %arg2[%c0_1, %c0_2] : memref<8x256xf32, #tpu.memory_space<vmem>>, vector<8x256xf32>
    %2 = arith.addf %0, %1 : vector<8x256xf32>
    %cst = arith.constant dense<0.000000e+00> : vector<256xf32>
    %3 = vector.multi_reduction <add>, %2, %cst [0] : vector<8x256xf32> to vector<256xf32>
    %4 = vector.shape_cast %3 : vector<256xf32> to vector<1x256xf32>
    %5 = arith.mulf %0, %0 : vector<8x256xf32>
    %6 = arith.mulf %1, %1 : vector<8x256xf32>
    %7 = arith.addf %5, %6 : vector<8x256xf32>
    %cst_3 = arith.constant dense<0.000000e+00> : vector<256xf32>
    %8 = vector.multi_reduction <add>, %7, %cst_3 [0] : vector<8x256xf32> to vector<256xf32>
    %9 = vector.shape_cast %8 : vector<256xf32> to vector<1x256xf32>
    %10 = tpu.concatenate %4, %9 in 0 : vector<1x256xf32>, vector<1x256xf32> -> vector<2x256xf32>
    %c0_4 = arith.constant 0 : index
    %c0_5 = arith.constant 0 : index
    %11 = vector.load %arg9[%c0_4, %c0_5] : memref<256x8xf32, #tpu.memory_space<vmem>>, vector<256x8xf32>
    %cst_6 = arith.constant dense<0.000000e+00> : vector<2x8xf32>
    %12 = tpu.matmul %10, %11, %cst_6 {dimension_numbers = #tpu.dot_dimension_numbers<[1], [0], [0], [1], [0, 0, 1, 1], [], []>} : vector<2x256xf32>, vector<256x8xf32>, vector<2x8xf32> -> vector<2x8xf32>
    %13 = vector.extract_strided_slice %12 {offsets = [0, 0], sizes = [1, 8], strides = [1, 1]} : vector<2x8xf32> to vector<1x8xf32>
    %cst_7 = arith.constant 0.001953125 : f32
    %14 = vector.broadcast %cst_7 : f32 to vector<1x8xf32>
    %15 = arith.mulf %13, %14 : vector<1x8xf32>
    %16 = vector.extract_strided_slice %12 {offsets = [1, 0], sizes = [1, 8], strides = [1, 1]} : vector<2x8xf32> to vector<1x8xf32>
    %cst_8 = arith.constant 0.001953125 : f32
    %17 = vector.broadcast %cst_8 : f32 to vector<1x8xf32>
    %18 = arith.mulf %16, %17 : vector<1x8xf32>
    %19 = arith.mulf %15, %15 : vector<1x8xf32>
    %20 = arith.subf %18, %19 : vector<1x8xf32>
    %cst_9 = arith.constant 0.000000e+00 : f32
    %21 = vector.broadcast %cst_9 : f32 to vector<1x8xf32>
    %22 = arith.maximumf %20, %21 : vector<1x8xf32>
    %cst_10 = arith.constant 9.99999974E-6 : f32
    %23 = vector.broadcast %cst_10 : f32 to vector<1x8xf32>
    %24 = arith.addf %22, %23 : vector<1x8xf32>
    %25 = math.rsqrt %24 : vector<1x8xf32>
    %26 = tpu.concatenate %15, %25 in 0 : vector<1x8xf32>, vector<1x8xf32> -> vector<2x8xf32>
    %c0_11 = arith.constant 0 : index
    %c0_12 = arith.constant 0 : index
    %27 = vector.load %arg8[%c0_11, %c0_12] : memref<8x256xf32, #tpu.memory_space<vmem>>, vector<8x256xf32>
    %cst_13 = arith.constant dense<0.000000e+00> : vector<2x256xf32>
    %28 = tpu.matmul %26, %27, %cst_13 {dimension_numbers = #tpu.dot_dimension_numbers<[1], [0], [0], [1], [0, 0, 1, 1], [], []>} : vector<2x8xf32>, vector<8x256xf32>, vector<2x256xf32> -> vector<2x256xf32>
    %29 = vector.extract_strided_slice %28 {offsets = [0, 0], sizes = [1, 256], strides = [1, 1]} : vector<2x256xf32> to vector<1x256xf32>
    %30 = vector.broadcast %29 : vector<1x256xf32> to vector<8x256xf32>
    %31 = arith.subf %0, %30 : vector<8x256xf32>
    %32 = vector.extract_strided_slice %28 {offsets = [1, 0], sizes = [1, 256], strides = [1, 1]} : vector<2x256xf32> to vector<1x256xf32>
    %33 = vector.broadcast %32 : vector<1x256xf32> to vector<8x256xf32>
    %34 = arith.mulf %31, %33 : vector<8x256xf32>
    %35 = vector.extract_strided_slice %28 {offsets = [0, 0], sizes = [1, 256], strides = [1, 1]} : vector<2x256xf32> to vector<1x256xf32>
    %36 = vector.broadcast %35 : vector<1x256xf32> to vector<8x256xf32>
    %37 = arith.subf %1, %36 : vector<8x256xf32>
    %38 = vector.extract_strided_slice %28 {offsets = [1, 0], sizes = [1, 256], strides = [1, 1]} : vector<2x256xf32> to vector<1x256xf32>
    %39 = vector.broadcast %38 : vector<1x256xf32> to vector<8x256xf32>
    %40 = arith.mulf %37, %39 : vector<8x256xf32>
    %cst_14 = arith.constant 0.000000e+00 : f32
    %41 = vector.broadcast %cst_14 : f32 to vector<8x2xf32>
    %42 = tpu.concatenate %41, %34, %41 in 1 : vector<8x2xf32>, vector<8x256xf32>, vector<8x2xf32> -> vector<8x260xf32>
    %43 = tpu.concatenate %41, %40, %41 in 1 : vector<8x2xf32>, vector<8x256xf32>, vector<8x2xf32> -> vector<8x260xf32>
    %c0_15 = arith.constant 0 : index
    %c0_16 = arith.constant 0 : index
    %44 = vector.load %arg6[%c0_15, %c0_16] : memref<5x256xf32, #tpu.memory_space<vmem>>, vector<1x256xf32>
    %45 = vector.extract_strided_slice %42 {offsets = [0, 0], sizes = [8, 256], strides = [1, 1]} : vector<8x260xf32> to vector<8x256xf32>
    %46 = vector.broadcast %44 : vector<1x256xf32> to vector<8x256xf32>
    %47 = arith.mulf %45, %46 : vector<8x256xf32>
    %48 = vector.extract_strided_slice %43 {offsets = [0, 0], sizes = [8, 256], strides = [1, 1]} : vector<8x260xf32> to vector<8x256xf32>
    %49 = vector.broadcast %44 : vector<1x256xf32> to vector<8x256xf32>
    %50 = arith.mulf %48, %49 : vector<8x256xf32>
    %c1 = arith.constant 1 : index
    %c0_17 = arith.constant 0 : index
    %51 = vector.load %arg6[%c1, %c0_17] : memref<5x256xf32, #tpu.memory_space<vmem>>, vector<1x256xf32>
    %52 = vector.extract_strided_slice %42 {offsets = [0, 1], sizes = [8, 256], strides = [1, 1]} : vector<8x260xf32> to vector<8x256xf32>
    %53 = vector.broadcast %51 : vector<1x256xf32> to vector<8x256xf32>
    %54 = arith.mulf %52, %53 : vector<8x256xf32>
    %55 = vector.extract_strided_slice %43 {offsets = [0, 1], sizes = [8, 256], strides = [1, 1]} : vector<8x260xf32> to vector<8x256xf32>
    %56 = vector.broadcast %51 : vector<1x256xf32> to vector<8x256xf32>
    %57 = arith.mulf %55, %56 : vector<8x256xf32>
    %c2 = arith.constant 2 : index
    %c0_18 = arith.constant 0 : index
    %58 = vector.load %arg6[%c2, %c0_18] : memref<5x256xf32, #tpu.memory_space<vmem>>, vector<1x256xf32>
    %59 = vector.extract_strided_slice %42 {offsets = [0, 2], sizes = [8, 256], strides = [1, 1]} : vector<8x260xf32> to vector<8x256xf32>
    %60 = vector.broadcast %58 : vector<1x256xf32> to vector<8x256xf32>
    %61 = arith.mulf %59, %60 : vector<8x256xf32>
    %62 = vector.extract_strided_slice %43 {offsets = [0, 2], sizes = [8, 256], strides = [1, 1]} : vector<8x260xf32> to vector<8x256xf32>
    %63 = vector.broadcast %58 : vector<1x256xf32> to vector<8x256xf32>
    %64 = arith.mulf %62, %63 : vector<8x256xf32>
    %c3 = arith.constant 3 : index
    %c0_19 = arith.constant 0 : index
    %65 = vector.load %arg6[%c3, %c0_19] : memref<5x256xf32, #tpu.memory_space<vmem>>, vector<1x256xf32>
    %66 = vector.extract_strided_slice %42 {offsets = [0, 3], sizes = [8, 256], strides = [1, 1]} : vector<8x260xf32> to vector<8x256xf32>
    %67 = vector.broadcast %65 : vector<1x256xf32> to vector<8x256xf32>
    %68 = arith.mulf %66, %67 : vector<8x256xf32>
    %69 = vector.extract_strided_slice %43 {offsets = [0, 3], sizes = [8, 256], strides = [1, 1]} : vector<8x260xf32> to vector<8x256xf32>
    %70 = vector.broadcast %65 : vector<1x256xf32> to vector<8x256xf32>
    %71 = arith.mulf %69, %70 : vector<8x256xf32>
    %c4 = arith.constant 4 : index
    %c0_20 = arith.constant 0 : index
    %72 = vector.load %arg6[%c4, %c0_20] : memref<5x256xf32, #tpu.memory_space<vmem>>, vector<1x256xf32>
    %73 = vector.extract_strided_slice %42 {offsets = [0, 4], sizes = [8, 256], strides = [1, 1]} : vector<8x260xf32> to vector<8x256xf32>
    %74 = vector.broadcast %72 : vector<1x256xf32> to vector<8x256xf32>
    %75 = arith.mulf %73, %74 : vector<8x256xf32>
    %76 = vector.extract_strided_slice %43 {offsets = [0, 4], sizes = [8, 256], strides = [1, 1]} : vector<8x260xf32> to vector<8x256xf32>
    %77 = vector.broadcast %72 : vector<1x256xf32> to vector<8x256xf32>
    %78 = arith.mulf %76, %77 : vector<8x256xf32>
    %79 = tpu.concatenate %47, %50, %54, %57, %61, %64, %68, %71, %75, %78 in 0 : vector<8x256xf32>, vector<8x256xf32>, vector<8x256xf32>, vector<8x256xf32>, vector<8x256xf32>, vector<8x256xf32>, vector<8x256xf32>, vector<8x256xf32>, vector<8x256xf32>, vector<8x256xf32> -> vector<80x256xf32>
    %c0_21 = arith.constant 0 : index
    %c0_22 = arith.constant 0 : index
    %80 = vector.load %arg3[%c0_21, %c0_22] : memref<16x80xf32, #tpu.memory_space<vmem>>, vector<16x80xf32>
    %cst_23 = arith.constant dense<0.000000e+00> : vector<16x256xf32>
    %81 = tpu.matmul %80, %79, %cst_23 {dimension_numbers = #tpu.dot_dimension_numbers<[1], [0], [0], [1], [0, 0, 1, 1], [], []>} : vector<16x80xf32>, vector<80x256xf32>, vector<16x256xf32> -> vector<16x256xf32>
    %c0_24 = arith.constant 0 : index
    %c0_25 = arith.constant 0 : index
    %82 = vector.load %arg5[%c0_24, %c0_25] : memref<16x1xf32, #tpu.memory_space<vmem>>, vector<16x1xf32>
    %83 = vector.broadcast %82 : vector<16x1xf32> to vector<16x256xf32>
    %84 = arith.addf %81, %83 : vector<16x256xf32>
    %85 = math.tanh %84 : vector<16x256xf32>
    %cst_26 = arith.constant 0.000000e+00 : f32
    %86 = vector.broadcast %cst_26 : f32 to vector<16x4xf32>
    %87 = tpu.concatenate %86, %85, %86 in 1 : vector<16x4xf32>, vector<16x256xf32>, vector<16x4xf32> -> vector<16x264xf32>
    %88 = vector.extract_strided_slice %87 {offsets = [0, 0], sizes = [16, 256], strides = [1, 1]} : vector<16x264xf32> to vector<16x256xf32>
    %c0_27 = arith.constant 0 : index
    %c0_28 = arith.constant 0 : index
    %89 = vector.load %arg7[%c0_27, %c0_28] : memref<9x256xf32, #tpu.memory_space<vmem>>, vector<1x256xf32>
    %90 = vector.broadcast %89 : vector<1x256xf32> to vector<16x256xf32>
    %91 = arith.mulf %88, %90 : vector<16x256xf32>
    %92 = vector.extract_strided_slice %87 {offsets = [0, 1], sizes = [16, 256], strides = [1, 1]} : vector<16x264xf32> to vector<16x256xf32>
    %c1_29 = arith.constant 1 : index
    %c0_30 = arith.constant 0 : index
    %93 = vector.load %arg7[%c1_29, %c0_30] : memref<9x256xf32, #tpu.memory_space<vmem>>, vector<1x256xf32>
    %94 = vector.broadcast %93 : vector<1x256xf32> to vector<16x256xf32>
    %95 = arith.mulf %92, %94 : vector<16x256xf32>
    %96 = vector.extract_strided_slice %87 {offsets = [0, 2], sizes = [16, 256], strides = [1, 1]} : vector<16x264xf32> to vector<16x256xf32>
    %c2_31 = arith.constant 2 : index
    %c0_32 = arith.constant 0 : index
    %97 = vector.load %arg7[%c2_31, %c0_32] : memref<9x256xf32, #tpu.memory_space<vmem>>, vector<1x256xf32>
    %98 = vector.broadcast %97 : vector<1x256xf32> to vector<16x256xf32>
    %99 = arith.mulf %96, %98 : vector<16x256xf32>
    %100 = vector.extract_strided_slice %87 {offsets = [0, 3], sizes = [16, 256], strides = [1, 1]} : vector<16x264xf32> to vector<16x256xf32>
    %c3_33 = arith.constant 3 : index
    %c0_34 = arith.constant 0 : index
    %101 = vector.load %arg7[%c3_33, %c0_34] : memref<9x256xf32, #tpu.memory_space<vmem>>, vector<1x256xf32>
    %102 = vector.broadcast %101 : vector<1x256xf32> to vector<16x256xf32>
    %103 = arith.mulf %100, %102 : vector<16x256xf32>
    %104 = vector.extract_strided_slice %87 {offsets = [0, 4], sizes = [16, 256], strides = [1, 1]} : vector<16x264xf32> to vector<16x256xf32>
    %c4_35 = arith.constant 4 : index
    %c0_36 = arith.constant 0 : index
    %105 = vector.load %arg7[%c4_35, %c0_36] : memref<9x256xf32, #tpu.memory_space<vmem>>, vector<1x256xf32>
    %106 = vector.broadcast %105 : vector<1x256xf32> to vector<16x256xf32>
    %107 = arith.mulf %104, %106 : vector<16x256xf32>
    %108 = vector.extract_strided_slice %87 {offsets = [0, 5], sizes = [16, 256], strides = [1, 1]} : vector<16x264xf32> to vector<16x256xf32>
    %c5 = arith.constant 5 : index
    %c0_37 = arith.constant 0 : index
    %109 = vector.load %arg7[%c5, %c0_37] : memref<9x256xf32, #tpu.memory_space<vmem>>, vector<1x256xf32>
    %110 = vector.broadcast %109 : vector<1x256xf32> to vector<16x256xf32>
    %111 = arith.mulf %108, %110 : vector<16x256xf32>
    %112 = vector.extract_strided_slice %87 {offsets = [0, 6], sizes = [16, 256], strides = [1, 1]} : vector<16x264xf32> to vector<16x256xf32>
    %c6 = arith.constant 6 : index
    %c0_38 = arith.constant 0 : index
    %113 = vector.load %arg7[%c6, %c0_38] : memref<9x256xf32, #tpu.memory_space<vmem>>, vector<1x256xf32>
    %114 = vector.broadcast %113 : vector<1x256xf32> to vector<16x256xf32>
    %115 = arith.mulf %112, %114 : vector<16x256xf32>
    %116 = vector.extract_strided_slice %87 {offsets = [0, 7], sizes = [16, 256], strides = [1, 1]} : vector<16x264xf32> to vector<16x256xf32>
    %c7 = arith.constant 7 : index
    %c0_39 = arith.constant 0 : index
    %117 = vector.load %arg7[%c7, %c0_39] : memref<9x256xf32, #tpu.memory_space<vmem>>, vector<1x256xf32>
    %118 = vector.broadcast %117 : vector<1x256xf32> to vector<16x256xf32>
    %119 = arith.mulf %116, %118 : vector<16x256xf32>
    %120 = vector.extract_strided_slice %87 {offsets = [0, 8], sizes = [16, 256], strides = [1, 1]} : vector<16x264xf32> to vector<16x256xf32>
    %c8 = arith.constant 8 : index
    %c0_40 = arith.constant 0 : index
    %121 = vector.load %arg7[%c8, %c0_40] : memref<9x256xf32, #tpu.memory_space<vmem>>, vector<1x256xf32>
    %122 = vector.broadcast %121 : vector<1x256xf32> to vector<16x256xf32>
    %123 = arith.mulf %120, %122 : vector<16x256xf32>
    %124 = tpu.concatenate %91, %95, %99, %103, %107, %111, %115, %119, %123 in 0 : vector<16x256xf32>, vector<16x256xf32>, vector<16x256xf32>, vector<16x256xf32>, vector<16x256xf32>, vector<16x256xf32>, vector<16x256xf32>, vector<16x256xf32>, vector<16x256xf32> -> vector<144x256xf32>
    %c0_41 = arith.constant 0 : index
    %c0_42 = arith.constant 0 : index
    %125 = vector.load %arg4[%c0_41, %c0_42] : memref<16x144xf32, #tpu.memory_space<vmem>>, vector<16x144xf32>
    %cst_43 = arith.constant dense<0.000000e+00> : vector<16x256xf32>
    %126 = tpu.matmul %125, %124, %cst_43 {dimension_numbers = #tpu.dot_dimension_numbers<[1], [0], [0], [1], [0, 0, 1, 1], [], []>} : vector<16x144xf32>, vector<144x256xf32>, vector<16x256xf32> -> vector<16x256xf32>
    %127 = tpu.concatenate %126, %126, %126, %126 in 0 : vector<16x256xf32>, vector<16x256xf32>, vector<16x256xf32>, vector<16x256xf32> -> vector<64x256xf32>
    %c0_44 = arith.constant 0 : index
    %c0_45 = arith.constant 0 : index
    %128 = vector.load %arg10[%c0_44, %c0_45] : memref<64x256xf32, #tpu.memory_space<vmem>>, vector<64x256xf32>
    %129 = arith.mulf %127, %128 : vector<64x256xf32>
    %130 = arith.mulf %126, %126 : vector<16x256xf32>
    %131 = tpu.concatenate %129, %130 in 0 : vector<64x256xf32>, vector<16x256xf32> -> vector<80x256xf32>
    %c0_46 = arith.constant 0 : index
    %c0_47 = arith.constant 0 : index
    %132 = vector.load %arg9[%c0_46, %c0_47] : memref<256x8xf32, #tpu.memory_space<vmem>>, vector<256x8xf32>
    %cst_48 = arith.constant dense<0.000000e+00> : vector<80x8xf32>
    %133 = tpu.matmul %131, %132, %cst_48 {dimension_numbers = #tpu.dot_dimension_numbers<[1], [0], [0], [1], [0, 0, 1, 1], [], []>} : vector<80x256xf32>, vector<256x8xf32>, vector<80x8xf32> -> vector<80x8xf32>
    %134 = vector.extract_strided_slice %133 {offsets = [0, 0], sizes = [64, 8], strides = [1, 1]} : vector<80x8xf32> to vector<64x8xf32>
    %135 = vector.extract_strided_slice %133 {offsets = [64, 0], sizes = [16, 8], strides = [1, 1]} : vector<80x8xf32> to vector<16x8xf32>
    %cst_49 = arith.constant 1.000000e-16 : f32
    %136 = vector.broadcast %cst_49 : f32 to vector<16x8xf32>
    %137 = arith.maximumf %135, %136 : vector<16x8xf32>
    %138 = math.rsqrt %137 : vector<16x8xf32>
    %c0_50 = arith.constant 0 : index
    %c0_51 = arith.constant 0 : index
    %139 = vector.load %arg11[%c0_50, %c0_51] : memref<64x1xf32, #tpu.memory_space<vmem>>, vector<64x1xf32>
    %140 = vector.broadcast %139 : vector<64x1xf32> to vector<64x8xf32>
    %141 = arith.mulf %134, %140 : vector<64x8xf32>
    %142 = tpu.concatenate %138, %138, %138, %138 in 0 : vector<16x8xf32>, vector<16x8xf32>, vector<16x8xf32>, vector<16x8xf32> -> vector<64x8xf32>
    %143 = arith.mulf %141, %142 : vector<64x8xf32>
    %c0_52 = arith.constant 0 : index
    %c0_53 = arith.constant 0 : index
    %144 = vector.load %arg12[%c0_52, %c0_53] : memref<4x64xf32, #tpu.memory_space<vmem>>, vector<4x64xf32>
    %cst_54 = arith.constant dense<0.000000e+00> : vector<4x8xf32>
    %145 = tpu.matmul %144, %143, %cst_54 {dimension_numbers = #tpu.dot_dimension_numbers<[1], [0], [0], [1], [0, 0, 1, 1], [], []>} : vector<4x64xf32>, vector<64x8xf32>, vector<4x8xf32> -> vector<4x8xf32>
    %c0_55 = arith.constant 0 : index
    %c0_56 = arith.constant 0 : index
    %146 = vector.load %arg13[%c0_55, %c0_56] : memref<4x1xf32, #tpu.memory_space<vmem>>, vector<4x1xf32>
    %147 = vector.broadcast %146 : vector<4x1xf32> to vector<4x8xf32>
    %148 = arith.addf %145, %147 : vector<4x8xf32>
    %c0_57 = arith.constant 0 : index
    %c0_58 = arith.constant 0 : index
    %c0_59 = arith.constant 0 : index
    %149 = vector.load %arg14[%c0_57, %c0_58, %c0_59] : memref<1x4x8xf32, #tpu.memory_space<vmem>>, vector<1x4x8xf32>
    %150 = vector.shape_cast %149 : vector<1x4x8xf32> to vector<4x8xf32>
    %151 = vector.shape_cast %148 : vector<4x8xf32> to vector<1x4x8xf32>
    tpu.vector_store %arg14[%c0_57, %c0_58, %c0_59], %151 {strides = array<i32>} : memref<1x4x8xf32, #tpu.memory_space<vmem>>, vector<1x4x8xf32>,
    return
  }
  func.func @transform_0(%arg0: i32) -> (i32, i32) {
    %c0_i32 = arith.constant 0 : i32
    %c0_i32_0 = arith.constant 0 : i32
    return %c0_i32, %arg0 : i32, i32
  }
  func.func @transform_1(%arg0: i32) -> (i32, i32) {
    %c0_i32 = arith.constant 0 : i32
    %c0_i32_0 = arith.constant 0 : i32
    return %c0_i32, %arg0 : i32, i32
  }
  func.func @transform_2(%arg0: i32) -> (i32, i32) {
    %c0_i32 = arith.constant 0 : i32
    %c0_i32_0 = arith.constant 0 : i32
    %c0_i32_1 = arith.constant 0 : i32
    return %c0_i32, %c0_i32_0 : i32, i32
  }
  func.func @transform_3(%arg0: i32) -> (i32, i32) {
    %c0_i32 = arith.constant 0 : i32
    %c0_i32_0 = arith.constant 0 : i32
    %c0_i32_1 = arith.constant 0 : i32
    return %c0_i32, %c0_i32_0 : i32, i32
  }
  func.func @transform_4(%arg0: i32) -> (i32, i32) {
    %c0_i32 = arith.constant 0 : i32
    %c0_i32_0 = arith.constant 0 : i32
    %c0_i32_1 = arith.constant 0 : i32
    return %c0_i32, %c0_i32_0 : i32, i32
  }
  func.func @transform_5(%arg0: i32) -> (i32, i32) {
    %c0_i32 = arith.constant 0 : i32
    %c0_i32_0 = arith.constant 0 : i32
    %c0_i32_1 = arith.constant 0 : i32
    return %c0_i32, %c0_i32_0 : i32, i32
  }
  func.func @transform_6(%arg0: i32) -> (i32, i32) {
    %c0_i32 = arith.constant 0 : i32
    %c0_i32_0 = arith.constant 0 : i32
    %c0_i32_1 = arith.constant 0 : i32
    return %c0_i32, %c0_i32_0 : i32, i32
  }
  func.func @transform_7(%arg0: i32) -> (i32, i32) {
    %c0_i32 = arith.constant 0 : i32
    %c0_i32_0 = arith.constant 0 : i32
    %c0_i32_1 = arith.constant 0 : i32
    return %c0_i32, %c0_i32_0 : i32, i32
  }
  func.func @transform_8(%arg0: i32) -> (i32, i32) {
    %c0_i32 = arith.constant 0 : i32
    %c0_i32_0 = arith.constant 0 : i32
    %c0_i32_1 = arith.constant 0 : i32
    return %c0_i32, %c0_i32_0 : i32, i32
  }
  func.func @transform_9(%arg0: i32) -> (i32, i32) {
    %c0_i32 = arith.constant 0 : i32
    %c0_i32_0 = arith.constant 0 : i32
    %c0_i32_1 = arith.constant 0 : i32
    return %c0_i32, %c0_i32_0 : i32, i32
  }
  func.func @transform_10(%arg0: i32) -> (i32, i32) {
    %c0_i32 = arith.constant 0 : i32
    %c0_i32_0 = arith.constant 0 : i32
    %c0_i32_1 = arith.constant 0 : i32
    return %c0_i32, %c0_i32_0 : i32, i32
  }
  func.func @transform_11(%arg0: i32) -> (i32, i32) {
    %c0_i32 = arith.constant 0 : i32
    %c0_i32_0 = arith.constant 0 : i32
    %c0_i32_1 = arith.constant 0 : i32
    return %c0_i32, %c0_i32_0 : i32, i32
  }
  func.func @transform_12(%arg0: i32) -> (i32, i32) {
    %c0_i32 = arith.constant 0 : i32
    %c0_i32_0 = arith.constant 0 : i32
    %c0_i32_1 = arith.constant 0 : i32
    return %c0_i32, %c0_i32_0 : i32, i32
  }
  func.func @transform_13(%arg0: i32) -> (i32, i32, i32) {
    %c0_i32 = arith.constant 0 : i32
    %c0_i32_0 = arith.constant 0 : i32
    %c0_i32_1 = arith.constant 0 : i32
    return %arg0, %c0_i32, %c0_i32_0 : i32, i32, i32
  }
}

</mosaic_0001>

<bundles_post_ra>
// kernel: dtn_forward.1
= control target key start
LH: loop header
LB: loop body
LE: loop exit
PB: predicated region body
PF: predicated region fallthrough
CT: control target
= control target key end

     0   :  { %s2588_s25 = smov 0   ;;  %s3174_s0 = inlined_call_operand.vmem [shape: f32[8,512], index: 0, kind: input, shape index: {}]   ;;  %s3175_s1 = inlined_call_operand.vmem [shape: f32[8,512], index: 1, kind: input, shape index: {}]   ;;  %s3176_s2 = inlined_call_operand.vmem [shape: f32[16,80], index: 2, kind: input, shape index: {}]   ;;  %s3177_s3 = inlined_call_operand.vmem [shape: f32[16,144], index: 3, kind: input, shape index: {}]   ;;  %s3178_s4 = inlined_call_operand.vmem [shape: f32[16,1], index: 4, kind: input, shape index: {}]   ;;  %s3179_s5 = inlined_call_operand.vmem [shape: f32[5,256], index: 5, kind: input, shape index: {}]   ;;  %s3180_s6 = inlined_call_operand.vmem [shape: f32[9,256], index: 6, kind: input, shape index: {}]   ;;  %s3181_s7 = inlined_call_operand.vmem [shape: f32[8,256], index: 7, kind: input, shape index: {}]   ;;  %s3182_s8 = inlined_call_operand.vmem [shape: f32[256,8], index: 8, kind: input, shape index: {}]   ;;  %s3183_s9 = inlined_call_operand.vmem [shape: f32[64,256], index: 9, kind: input, shape index: {}]   ;;  %s3184_s10 = inlined_call_operand.vmem [shape: f32[64,1], index: 10, kind: input, shape index: {}]   ;;  %s3185_s11 = inlined_call_operand.vmem [shape: f32[4,64], index: 11, kind: input, shape index: {}]   ;;  %s3186_s12 = inlined_call_operand.vmem [shape: f32[4,1], index: 12, kind: input, shape index: {}]   ;;  %s3187_s13 = inlined_call_operand.vmem [shape: f32[2,4,8], index: 13, kind: output, shape index: {}]  }
   0x1 LB: > { %s2594_s26 = sadd.s32 4294967295, %s2496_s25   ;;  %p1983_p0 = scmp.ge.s32.totalorder %s2496_s25, 1  ;;  %s2496_s25 = sphi %s2588_s25, %s23_s25  }
   0x2   : > { %p399_p1 = scmp.lt.s32.totalorder %s2496_s25, 3 }
   0x4   : > { %p400_p2 = pnand %p1983_p0, %p399_p1 }
   0x5   : > { %v518_v0 = vld [vmem:[%s3182_s8 + $0x80] sm:$0xff] (!%p400_p2)  ;;  %v519_v1 = vld [vmem:[%s3182_s8 + $0x88] sm:$0xff] (!%p400_p2)  ;;  %s1984_s16 = sshll.u32 (!%p400_p2), %s2594_s26, 1  ;;  %v520_v5 = vld [vmem:[%s3182_s8 + $0x90] sm:$0xff] (!%p400_p2)  ;;  %vm499_vm0 = vcmask (!%p400_p2), 1040384   ;;  %vm616_vm1 = vcmask (!%p400_p2), 64512  }
   0x6   : > { %403 = sbr.rel (%p400_p2) target bundleno = 2007 (0x7d7), region = 72  ;;  %v502_v2 = vld [vmem:[%s3182_s8] sm:$0xff] (!%p400_p2)  ;;  %v2608_v3 = vpack.c.bf16 (!%p400_p2), %v519_v1, %v518_v0  ;;  %v503_v4 = vld [vmem:[%s3182_s8 + $0x8] sm:$0xff] (!%p400_p2)  ;;  %v521_v6 = vld [vmem:[%s3182_s8 + $0x98] sm:$0xff] (!%p400_p2)  ;;  %p448_p3 = scmp.lt.s32.totalorder (!%p400_p2), %s1984_s16, 3  ;;  %vm721_vm2 = vcmask (!%p400_p2), 15360  }
   0x7   : > { %v2619_v7 = vpack.c.bf16 (!%p400_p2), %v503_v4, %v502_v2  ;;  %v2621_v8 = vpack.c.bf16 (!%p400_p2), %v521_v6, %v520_v5  ;;  %v504_v9 = vld [vmem:[%s3182_s8 + $0x10] sm:$0xff] (!%p400_p2)  ;;  %v505_v10 = vld [vmem:[%s3182_s8 + $0x18] sm:$0xff] (!%p400_p2)  ;;  %v522_v11 = vld [vmem:[%s3182_s8 + $0xa0] sm:$0xff] (!%p400_p2)  ;;  %s2499_s14 = smov (!%p400_p2), 1   ;;  %s2500_s15 = smov (!%p400_p2), 2   ;;  %vm771_vm3 = vcmask (!%p400_p2), 7168  }
   0x8   : > { %2135 = vmatprep.subr.bf16.mxu0 (!%p400_p2), %v2608_v3  ;;  %v523_v12 = vld [vmem:[%s3182_s8 + $0xa8] sm:$0xff] (!%p400_p2)  ;;  %v2637_v13 = vpack.c.bf16 (!%p400_p2), %v505_v10, %v504_v9  ;;  %v506_v15 = vld [vmem:[%s3182_s8 + $0x20] sm:$0xff] (!%p400_p2)  ;;  %v524_v17 = vld [vmem:[%s3182_s8 + $0xb0] sm:$0xff] (!%p400_p2)  ;;  %s2501_s23 = smov (!%p400_p2), 3   ;;  %s2502_s24 = smov (!%p400_p2), 4   ;;  %vm822_vm4 = vcmask (!%p400_p2), 23552  }
   0x9   : > { %2137 = vmatpush3.bf16.msra.mxu0 (!%p400_p2), %v2619_v7  ;;  %v2640_v14 = vpack.c.bf16 (!%p400_p2), %v523_v12, %v522_v11  ;;  %v507_v16 = vld [vmem:[%s3182_s8 + $0x28] sm:$0xff] (!%p400_p2)  ;;  %v525_v18 = vld [vmem:[%s3182_s8 + $0xb8] sm:$0xff] (!%p400_p2)  ;;  %v508_v20 = vld [vmem:[%s3182_s8 + $0x30] sm:$0xff] (!%p400_p2)  ;;  %s2503_s28 = smov (!%p400_p2), 127   ;;  %s2504_s29 = smov (!%p400_p2), 126   ;;  %vm848_vm5 = vcmask (!%p400_p2), 31744  }
   0xa   : > { %2139 = vmatprep.subr.bf16.mxu0 (!%p400_p2), %v2621_v8  ;;  %v2658_v19 = vpack.c.bf16 (!%p400_p2), %v507_v16, %v506_v15  ;;  %v509_v21 = vld [vmem:[%s3182_s8 + $0x38] sm:$0xff] (!%p400_p2)  ;;  %v2670_v22 = vpack.c.bf16 (!%p400_p2), %v525_v18, %v524_v17  ;;  %v526_v23 = vld [vmem:[%s3182_s8 + $0xc0] sm:$0xff] (!%p400_p2)  ;;  %v527_v24 = vld [vmem:[%s3182_s8 + $0xc8] sm:$0xff] (!%p400_p2)  ;;  %vm868_vm6 = vcmask (!%p400_p2), 1039360   ;;  %vm895_vm7 = vcmask (!%p400_p2), 1031168   ;;  %s2509_s27 = smov (!%p400_p2), 6  }
   0xb   : > { %v2680_v26 = vpack.c.bf16 (!%p400_p2), %v509_v21, %v508_v20  ;;  %v2700_v35 = vpack.c.bf16 (!%p400_p2), %v527_v24, %v526_v23  ;;  %v510_v36 = vld [vmem:[%s3182_s8 + $0x40] sm:$0xff] (!%p400_p2)  ;;  %v511_v37 = vld [vmem:[%s3182_s8 + $0x48] sm:$0xff] (!%p400_p2)  ;;  %v528_v39 = vld [vmem:[%s3182_s8 + $0xd0] sm:$0xff] (!%p400_p2)  ;;  %vm922_vm8 = vcmask (!%p400_p2), 1022976   ;;  %vm949_vm9 = vcmask (!%p400_p2), 1014784   ;;  %s2510_s17 = smov (!%p400_p2), 7  }
   0xc   : > { %v529_v40 = vld [vmem:[%s3182_s8 + $0xd8] sm:$0xff] (!%p400_p2)  ;;  %v2152_v45 = vpack.c.bf16 (!%p400_p2), %v511_v37, %v510_v36  ;;  %v512_v50 = vld [vmem:[%s3182_s8 + $0x50] sm:$0xff] (!%p400_p2)  ;;  %v530_v53 = vld [vmem:[%s3182_s8 + $0xe0] sm:$0xff] (!%p400_p2)  ;;  %vm981_vm10 = vcmask (!%p400_p2), 654336   ;;  %s2511_s18 = smov (!%p400_p2), 8   ;;  %vm1224_vm11 = vcmask (!%p400_p2), 39936  }
   0xd   : > { %s3189_s16 = smov (!%p448_p3, %s1984_s16), 3  ;;  %2141 = vmatpush3.bf16.msra.mxu0 %v2637_v13  ;;  %v2154_v49 = vpack.c.bf16 %v529_v40, %v528_v39  ;;  %v513_v51 = vld [vmem:[%s3182_s8 + $0x58] sm:$0xff]  ;;  %v531_v54 = vld [vmem:[%s3182_s8 + $0xe8] sm:$0xff]  ;;  %v514_v0 = vld [vmem:[%s3182_s8 + $0x60] sm:$0xff]  ;;  %v691_v40 = vlaneseq  ;;  %vm1250_vm12 = vcmask 48128   ;;  %vm1276_vm13 = vcmask 56320  }
   0xe   : > { %s1985_s21 = sshll.u32 %s3189_s16, 3  ;;  %2143 = vmatprep.subr.bf16.mxu0 %v2640_v14  ;;  %v2156_v59 = vpack.c.bf16 %v513_v51, %v512_v50  ;;  %v2158_v63 = vpack.c.bf16 %v531_v54, %v530_v53  ;;  %v515_v1 = vld [vmem:[%s3182_s8 + $0x68] sm:$0xff]  ;;  %v532_v4 = vld [vmem:[%s3182_s8 + $0xf0] sm:$0xff]  ;;  %v533_v5 = vld [vmem:[%s3182_s8 + $0xf8] sm:$0xff]  ;;  %s2506_s16 = smov 124   ;;  %vm1528_vm14 = vcmask 130048  }
   0xf   : > { %s451_s30 = scalar_lea.vmem %s3174_s0, %s1985_s21  ;;  %s457_s20 = scalar_lea.vmem %s3175_s1, %s1985_s21  ;;  %v2160_v11 = vpack.c.bf16 %v515_v1, %v514_v0  ;;  %v2162_v17 = vpack.c.bf16 %v533_v5, %v532_v4  ;;  %v516_v18 = vld [vmem:[%s3182_s8 + $0x70] sm:$0xff]  ;;  %v517_v20 = vld [vmem:[%s3182_s8 + $0x78] sm:$0xff]  ;;  %v740_v5 = vld [vmem:[%s3179_s5] ss:$8 sm:$0x3]  ;;  %vm1434_vm15 = vcmask 1006592  }
  0x10   : > { %v2678_v25 = vld [vmem:[%s451_s30 + $0x8] sm:$0xff]  ;;  %v2686_v29 = vld [vmem:[%s451_s30] sm:$0xff]  ;;  %v2164_v24 = vpack.c.bf16 %v517_v20, %v516_v18  ;;  %s2505_s30 = smov 125   ;;  %p459_p4 = scmp.lt.s32.totalorder %s2594_s26, 1 }
  0x11   : > { %v2682_v27 = vld [vmem:[%s457_s20 + $0x8] sm:$0xff]  ;;  %v482_v28 = vmul.f32 %v2678_v25, %v2678_v25  ;;  %v2688_v30 = vld [vmem:[%s457_s20] sm:$0xff]  ;;  %2145 = vmatpush3.bf16.msra.mxu0 %v2658_v19  ;;  %v481_v34 = vmul.f32 %v2686_v29, %v2686_v29  ;;  %s2508_s20 = smov 5  }
  0x12   : > { %v468_v31 = vadd.f32 %v2682_v27, %v2678_v25  ;;  %v484_v32 = vmul.f32 %v2682_v27, %v2682_v27  ;;  %v467_v33 = vadd.f32 %v2688_v30, %v2686_v29  ;;  %2147 = vmatprep.subr.bf16.mxu0 %v2670_v22  ;;  %v483_v38 = vmul.f32 %v2688_v30, %v2688_v30  ;;  %s3191_s26 = smov (!%p459_p4, %s2594_s26), 1 }
  0x14   : > { %v475_v41 = vrot.slane %v468_v31, 4  ;;  %v486_v42 = vadd.f32 %v484_v32, %v482_v28  ;;  %v469_v43 = vrot.slane %v467_v33, 4  ;;  %v485_v44 = vadd.f32 %v483_v38, %v481_v34 }
  0x15   : > { %2149 = vmatpush3.bf16.msra.mxu0 %v2680_v26 }
  0x16   : > { %v476_v46 = vadd.f32 %v475_v41, %v468_v31  ;;  %v493_v47 = vrot.slane %v486_v42, 4  ;;  %v470_v48 = vadd.f32 %v469_v43, %v467_v33  ;;  %2151 = vmatprep.subr.bf16.mxu0 %v2700_v35  ;;  %v487_v52 = vrot.slane %v485_v44, 4 }
  0x17   : > { %v692_v41 = vshrl.u32 %v691_v40, 7 }
  0x18   : > { %v477_v55 = vrot.slane %v476_v46, 2  ;;  %v494_v56 = vadd.f32 %v493_v47, %v486_v42  ;;  %v471_v57 = vrot.slane %v470_v48, 2  ;;  %v488_v58 = vadd.f32 %v487_v52, %v485_v44  ;;  %v1990_v44 = vld [vmem:[%s3179_s5 + $0x1] ss:$8 sm:$0x3] }
  0x19   : > { %2153 = vmatpush3.bf16.msra.mxu0 %v2152_v45  ;;  %v2769_v42 = vsub.s32 0, %v692_v41  ;;  %v2771_v43 = vsub.s32 1, %v692_v41 }
  0x1a   : > { %v478_v60 = vadd.f32 %v477_v55, %v476_v46  ;;  %v495_v61 = vrot.slane %v494_v56, 2  ;;  %v472_v62 = vadd.f32 %v471_v57, %v470_v48  ;;  %2155 = vmatprep.subr.bf16.mxu0 %v2154_v49  ;;  %v489_v2 = vrot.slane %v488_v58, 2 }
  0x1b   : > { %v762_v46 = vrot.slane %v1990_v44, %v2769_v42 }
  0x1c   : > { %v479_v6 = vrot.slane %v478_v60, 1  ;;  %v496_v9 = vadd.f32 %v495_v61, %v494_v56  ;;  %v490_v10 = vadd.f32 %v489_v2, %v488_v58  ;;  %v473_v16 = vrot.slane %v472_v62, 1 }
  0x1d   : > { %2157 = vmatpush3.bf16.msra.mxu0 %v2156_v59  ;;  %767 = vrot.lane.b32.xlu0 %v762_v46, %s2499_s14 }
  0x1e   : > { %v480_v12 = vadd.f32 %v479_v6, %v478_v60  ;;  %v497_v15 = vrot.slane %v496_v9, 1  ;;  %2159 = vmatprep.subr.bf16.mxu0 %v2158_v63  ;;  %v491_v21 = vrot.slane %v490_v10, 1  ;;  %v474_v31 = vadd.f32 %v473_v16, %v472_v62 }
  0x20   : > { %v498_v23 = vadd.f32 %v497_v15, %v496_v9  ;;  %v492_v32 = vadd.f32 %v491_v21, %v490_v10  ;;  %v745_v10 = vrot.slane %v740_v5, %v2769_v42 }
  0x21   : > { %2161 = vmatpush3.bf16.msra.mxu0 %v2160_v11 }
  0x22   : > { %v501_v28 = vsel %vm499_vm0, %v480_v12, %v498_v23  ;;  %2163 = vmatprep.subr.bf16.mxu0 %v2162_v17  ;;  %v500_v33 = vsel %vm499_vm0, %v474_v31, %v492_v32 }
  0x23   : > { %598 = vmatprep.mubr.f32.mxu0 %v501_v28 }
  0x25   : > { %2165 = vmatpush3.bf16.msra.mxu0 %v2164_v24 }
  0x26   : > { %2223 = vmatprep.subr.bf16.mxu0 %v2608_v3  ;;  %v615_v3 = vld [vmem:[%s3181_s7 + $0x8] sm:$0xff] }
  0x27   : > { %620 = vmatprep.subr.mxu1 %v615_v3 }
  0x28   : > { %599 = vmatmul.mubr.f32.vlgmr.msra.gmra.mrb[0].mxu0 %v500_v33 }
  0x29   : > { %2225 = vmatpush3.bf16.msra.mxu0 %v2619_v7  ;;  %v614_v7 = vld [vmem:[%s3181_s7] sm:$0xff] }
  0x2a   : > { %2227 = vmatprep.subr.bf16.mxu0 %v2621_v8  ;;  %v2498_v8 = vmov 0.0   ;;  %621 = vmatpush1.msra.mxu1 %v614_v7 }
  0x2b   : > { %684 = vmatprep.mubr.f32.mxu1 %v2498_v8 }
  0x2d   : > { %2229 = vmatpush3.bf16.msra.mxu0 %v2637_v13 }
  0x2e   : > { %2231 = vmatprep.subr.bf16.mxu0 %v2640_v14 }
  0x31   : > { %2233 = vmatpush3.bf16.msra.mxu0 %v2658_v19 }
  0x32   : > { %2235 = vmatprep.subr.bf16.mxu0 %v2670_v22 }
  0x35   : > { %2237 = vmatpush3.bf16.msra.mxu0 %v2680_v26 }
  0x36   : > { %2239 = vmatprep.subr.bf16.mxu0 %v2700_v35 }
  0x39   : > { %2241 = vmatpush3.bf16.msra.mxu0 %v2152_v45  ;;  %v766_v45 = vrot.slane %v1990_v44, %v2771_v43 }
  0x3a   : > { %2243 = vmatprep.subr.bf16.mxu0 %v2154_v49 }
  0x3b   : > { %769 = vrot.lane.b32.xlu1 %v766_v45, %s2499_s14 }
  0x3d   : > { %2245 = vmatpush3.bf16.msra.mxu0 %v2156_v59 }
  0x3e   : > { %2247 = vmatprep.subr.bf16.mxu0 %v2158_v63  ;;  %v1993_v63 = vld [vmem:[%s3179_s5 + $0x4] ss:$8 sm:$0x3] }
  0x3f   : > { %v843_v0 = vrot.slane %v1993_v63, %v2771_v43  ;;  %v839_v1 = vrot.slane %v1993_v63, %v2769_v42 }
  0x41   : > { %2249 = vmatpush3.bf16.msra.mxu0 %v2160_v11 }
  0x42   : > { %2251 = vmatprep.subr.bf16.mxu0 %v2162_v17  ;;  %v749_v17 = vrot.slane %v740_v5, %v2771_v43 }
  0x45   : > { %2253 = vmatpush3.bf16.msra.mxu0 %v2164_v24 }
  0x8f   : > { %v768_v4 = vpop.permute.xlu0 %767 }
  0xad   : > { %v770_v2 = vpop.permute.xlu1 %769 }
  0xfb   : > { %v2041_v13 = vpop.f32.mrb[0].mxu0 }
  0xfc   : > { %v2042_v14 = vpop.f32.mrb[1].mxu0 }
  0xfd   : > { %v2043_v19 = vadd.f32 %v2042_v14, %v2041_v13 }
  0xff   : > { %v604_v22 = vmul.f32 0.001953125, %v2043_v19 }
 0x101   : > { %v605_v26 = vmul.f32 %v604_v22, %v604_v22 }
 0x103   : > { %v607_v34 = vrot.slane %v605_v26, 7 }
 0x105   : > { %v609_v35 = vsub.f32 %v604_v22, %v607_v34  ;;  %v772_v34 = vsel %vm771_vm3, %v768_v4, %v770_v2 }
 0x107   : > { %v610_v36 = vmax.f32 %v609_v35, 0.0 }
 0x109   : > { %v611_v37 = vadd.f32 1e-05, %v610_v36 }
 0x10b   : > { %2476 = vrsqrt.f32 %v611_v37 }
 0x115   : > { %v2477_v38 = vpop.eup %2476 }
 0x116   : > { %v613_v39 = vsel %vm499_vm0, %v604_v22, %v2477_v38  ;;  %vm1461_vm0 = vcmask 998400  }
 0x117   : > { %1989 = vmatmul.mubr.msk.f32.vlgmr.msra.gmra.mrb[0].mxu1 %vm616_vm1, %v613_v39 }
 0x118   : > { %1052 = vmatprep.mubr.f32.mxu1 %v2498_v8 }
 0x1ea   : > { %v686_v47 = vpop.f32.mrb[0].mxu1 }
 0x1eb   : > { %v694_v48 = vrot.slane %v686_v47, %v2769_v42  ;;  %v688_v49 = vpop.f32.mrb[1].mxu1  ;;  %v704_v52 = vrot.slane %v686_v47, %v2771_v43 }
 0x1ec   : > { %v698_v50 = vrot.slane %v688_v49, %v2769_v42  ;;  %v708_v58 = vrot.slane %v688_v49, %v2771_v43 }
 0x1ed   : > { %v699_v51 = vsub.f32 %v2686_v29, %v694_v48  ;;  %v711_v53 = vsub.f32 %v2688_v30, %v694_v48  ;;  %v1991_v29 = vld [vmem:[%s3179_s5 + $0x2] ss:$8 sm:$0x3]  ;;  %v1992_v30 = vld [vmem:[%s3179_s5 + $0x3] ss:$8 sm:$0x3] }
 0x1ee   : > { %v700_v56 = vsub.f32 %v2678_v25, %v698_v50  ;;  %v712_v57 = vsub.f32 %v2682_v27, %v698_v50  ;;  %v792_v25 = vrot.slane %v1991_v29, %v2771_v43  ;;  %v788_v27 = vrot.slane %v1991_v29, %v2769_v42 }
 0x1ef   : > { %v709_v54 = vmul.f32 %v704_v52, %v699_v51  ;;  %v713_v55 = vmul.f32 %v711_v53, %v704_v52  ;;  %v817_v61 = vrot.slane %v1992_v30, %v2771_v43  ;;  %v813_v62 = vrot.slane %v1992_v30, %v2769_v42 }
 0x1f0   : > { %v710_v59 = vmul.f32 %v708_v58, %v700_v56  ;;  %v714_v60 = vmul.f32 %v712_v57, %v708_v58 }
 0x1f1   : > { %730 = vrot.lane.b32.xlu1 %v713_v55, %s2500_s15  ;;  %717 = vrot.lane.b32.xlu0 %v709_v54, %s2500_s15 }
 0x1f5   : > { %732 = vrot.lane.b32.xlu1 %v714_v60, %s2500_s15  ;;  %719 = vrot.lane.b32.xlu0 %v710_v59, %s2500_s15 }
 0x1f9   : > { %795 = vrot.lane.b32.xlu1 %v792_v25, %s2500_s15  ;;  %793 = vrot.lane.b32.xlu0 %v788_v27, %s2500_s15 }
 0x1fd   : > { %820 = vrot.lane.b32.xlu1 %v817_v61, %s2501_s23  ;;  %818 = vrot.lane.b32.xlu0 %v813_v62, %s2501_s23 }
 0x201   : > { %846 = vrot.lane.b32.xlu1 %v843_v0, %s2502_s24  ;;  %844 = vrot.lane.b32.xlu0 %v839_v1, %s2502_s24 }
 0x263   : > { %v731_v6 = vpop.permute.xlu1 %730  ;;  %v718_v9 = vpop.permute.xlu0 %717 }
 0x264   : > { %v2818_v11 = vsel %vm721_vm2, 0.0, %v731_v6  ;;  %v2821_v12 = vsel %vm721_vm2, 0.0, %v718_v9 }
 0x265   : > { %v776_v15 = vmul.f32 %v768_v4, %v2821_v12  ;;  %v779_v16 = vmul.f32 %v768_v4, %v2818_v11  ;;  %v754_v23 = vmul.f32 %v745_v10, %v2818_v11  ;;  %v752_v24 = vmul.f32 %v745_v10, %v2821_v12 }
 0x267   : > { %v733_v18 = vpop.permute.xlu1 %732  ;;  %v720_v20 = vpop.permute.xlu0 %719  ;;  %v2294_v21 = vpack.i.bf16 %v779_v16, %v776_v15  ;;  %v2168_v22 = vpack.c.bf16 %v754_v23, %v752_v24  ;;  %v2507_v15 = vmov 0  }
 0x268   : > { %v2829_v28 = vsel %vm721_vm2, %v731_v6, %v733_v18  ;;  %v722_v31 = vsel %vm721_vm2, %v718_v9, %v720_v20  ;;  %v739_v14 = vsel %vm721_vm2, %v733_v18, 0.0  ;;  %v727_v36 = vsel %vm721_vm2, %v720_v20, 0.0  ;;  %2354 = vset.pattern.permute.xlu0 %v2507_v15  ;;  %2355 = vset.pattern.permute.xlu1 %v2507_v15 }
 0x269   : > { %2295 = vrot.lane.b32.xlu0 %v2294_v21, %s2503_s28  ;;  %v753_v32 = vmul.f32 %v749_v17, %v722_v31  ;;  %v755_v33 = vmul.f32 %v749_v17, %v2829_v28  ;;  %v781_v35 = vmul.f32 %v770_v2, %v739_v14  ;;  %v780_v40 = vmul.f32 %v772_v34, %v2829_v28 }
 0x26a   : > { %v778_v46 = vmul.f32 %v770_v2, %v727_v36  ;;  %v777_v47 = vmul.f32 %v772_v34, %v722_v31 }
 0x26b   : > { %v796_v3 = vpop.permute.xlu1 %795  ;;  %v794_v7 = vpop.permute.xlu0 %793  ;;  %v2166_v13 = vpack.c.bf16 %v755_v33, %v753_v32  ;;  %v2314_v50 = vpack.i.bf16 %v781_v35, %v780_v40 }
 0x26c   : > { %v801_v19 = vmul.f32 %v794_v7, %v2821_v12  ;;  %v804_v26 = vmul.f32 %v794_v7, %v2818_v11  ;;  %v797_v41 = vsel %vm721_vm2, %v794_v7, %v796_v3  ;;  %v803_v48 = vmul.f32 %v796_v3, %v727_v36 }
 0x26d   : > { %2167 = vmatprep.subr.bf16.mxu1 %v2166_v13  ;;  %v802_v49 = vmul.f32 %v797_v41, %v722_v31  ;;  %v806_v55 = vmul.f32 %v796_v3, %v739_v14  ;;  %v805_v56 = vmul.f32 %v797_v41, %v2829_v28  ;;  %v2309_v59 = vpack.i.bf16 %v778_v46, %v777_v47 }
 0x26e   : > { %2169 = vmatpush1.bf16.msra.mxu1 %v2168_v22  ;;  %v2299_v39 = vpack.i.bf16 %v804_v26, %v801_v19 }
 0x26f   : > { %v821_v37 = vpop.permute.xlu1 %820  ;;  %v819_v38 = vpop.permute.xlu0 %818  ;;  %v2319_v29 = vpack.i.bf16 %v803_v48, %v802_v49  ;;  %v2324_v62 = vpack.i.bf16 %v806_v55, %v805_v56 }
 0x270   : > { %v827_v44 = vmul.f32 %v819_v38, %v2821_v12  ;;  %v830_v45 = vmul.f32 %v819_v38, %v2818_v11  ;;  %2300 = vrot.lane.b32.xlu1 %v2299_v39, %s2504_s29  ;;  %v823_v52 = vsel %vm822_vm4, %v819_v38, %v821_v37  ;;  %v832_v57 = vmul.f32 %v821_v37, %v739_v14 }
 0x271   : > { %v831_v58 = vmul.f32 %v823_v52, %v2829_v28  ;;  %v829_v25 = vmul.f32 %v821_v37, %v727_v36  ;;  %v828_v27 = vmul.f32 %v823_v52, %v722_v31 }
 0x272   : > { %v2304_v51 = vpack.i.bf16 %v830_v45, %v827_v44 }
 0x273   : > { %v847_v53 = vpop.permute.xlu1 %846  ;;  %v845_v54 = vpop.permute.xlu0 %844  ;;  %v2334_v63 = vpack.i.bf16 %v832_v57, %v831_v58  ;;  %v2329_v1 = vpack.i.bf16 %v829_v25, %v828_v27 }
 0x274   : > { %2315 = vrot.lane.b32.xlu1 %v2314_v50, %s2503_s28  ;;  %2305 = vrot.lane.b32.xlu0 %v2304_v51, %s2505_s30  ;;  %v849_v60 = vsel %vm848_vm5, %v845_v54, %v847_v53  ;;  %v855_v30 = vmul.f32 %v847_v53, %v727_v36  ;;  %v858_v0 = vmul.f32 %v847_v53, %v739_v14 }
 0x275   : > { %v854_v61 = vmul.f32 %v849_v60, %v722_v31  ;;  %v853_v2 = vmul.f32 %v845_v54, %v2821_v12  ;;  %v856_v4 = vmul.f32 %v845_v54, %v2818_v11  ;;  %v857_v5 = vmul.f32 %v849_v60, %v2829_v28  ;;  %v969_v11 = vld [vmem:[%s3178_s4] sm:$0xff]  ;;  %v970_v12 = vld [vmem:[%s3178_s4 + $0x8] sm:$0xff] }
 0x277   : > { %v2339_v6 = vpack.i.bf16 %v855_v30, %v854_v61  ;;  %v2344_v9 = vpack.i.bf16 %v858_v0, %v857_v5  ;;  %v2349_v10 = vpack.i.bf16 %v856_v4, %v853_v2 }
 0x278   : > { %2320 = vrot.lane.b32.xlu1 %v2319_v29, %s2504_s29  ;;  %2310 = vrot.lane.b32.xlu0 %v2309_v59, %s2503_s28 }
 0x27c   : > { %2325 = vrot.lane.b32.xlu0 %v2324_v62, %s2504_s29  ;;  %2335 = vrot.lane.b32.xlu1 %v2334_v63, %s2505_s30 }
 0x280   : > { %2330 = vrot.lane.b32.xlu0 %v2329_v1, %s2505_s30  ;;  %2340 = vrot.lane.b32.xlu1 %v2339_v6, %s2506_s16 }
 0x284   : > { %2345 = vrot.lane.b32.xlu0 %v2344_v9, %s2506_s16  ;;  %2350 = vrot.lane.b32.xlu1 %v2349_v10, %s2506_s16 }
 0x288   : > { %973 = vperm.xlu0 %2354, %v969_v11   ;;  %978 = vperm.xlu1 %2355, %v970_v12   ;;  %v967_v12 = vld [vmem:[%s3176_s2] sm:$0xff] }
 0x2db   : > { %v2296_v16 = vpop.permute.xlu0 %2295 }
 0x2dc   : > { %v2298_v24 = vunpack.i.h.bf16 %v2296_v16  ;;  %v2297_v32 = vunpack.i.l.bf16 %v2296_v16  ;;  %v968_v16 = vld [vmem:[%s3176_s2 + $0x8] sm:$0xff] }
 0x2e2   : > { %v2301_v17 = vpop.permute.xlu1 %2300 }
 0x2e3   : > { %v2303_v38 = vunpack.i.h.bf16 %v2301_v17  ;;  %v2302_v39 = vunpack.i.l.bf16 %v2301_v17  ;;  %v1996_v17 = vld [vmem:[%s3180_s6 + $0x1] ss:$8 sm:$0x3] }
 0x2e6   : > { %v2316_v18 = vpop.permute.xlu1 %2315  ;;  %v2306_v20 = vpop.permute.xlu0 %2305 }
 0x2e7   : > { %v2318_v21 = vunpack.i.h.bf16 %v2316_v18  ;;  %v2317_v23 = vunpack.i.l.bf16 %v2316_v18  ;;  %v2308_v50 = vunpack.i.h.bf16 %v2306_v20  ;;  %v2307_v55 = vunpack.i.l.bf16 %v2306_v20 }
 0x2e8   : > { %v1115_v18 = vrot.slane %v1996_v17, %v2769_v42  ;;  %v1119_v20 = vrot.slane %v1996_v17, %v2771_v43 }
 0x2e9   : > { %v882_v7 = vsel %vm868_vm6, %v2298_v24, %v2317_v23  ;;  %v883_v13 = vsel %vm868_vm6, %v2317_v23, %v2318_v21 }
 0x2ea   : > { %v2321_v28 = vpop.permute.xlu1 %2320  ;;  %v2311_v31 = vpop.permute.xlu0 %2310  ;;  %1120 = vrot.lane.b32.xlu1 %v1115_v18, %s2499_s14  ;;  %1122 = vrot.lane.b32.xlu0 %v1119_v20, %s2499_s14  ;;  %s2512_s14 = smov 123  }
 0x2eb   : > { %v2313_v33 = vunpack.i.h.bf16 %v2311_v31  ;;  %v2312_v3 = vunpack.i.l.bf16 %v2311_v31  ;;  %v2323_v14 = vunpack.i.h.bf16 %v2321_v28  ;;  %v2322_v19 = vunpack.i.l.bf16 %v2321_v28 }
 0x2ed   : > { %v869_v22 = vsel %vm868_vm6, %v2297_v32, %v2312_v3  ;;  %v870_v26 = vsel %vm868_vm6, %v2312_v3, %v2313_v33  ;;  %v896_v46 = vsel %vm895_vm7, %v2302_v39, %v2322_v19  ;;  %v897_v48 = vsel %vm895_vm7, %v2322_v19, %v2323_v14 }
 0x2ee   : > { %v2172_v34 = vpack.c.bf16 %v882_v7, %v869_v22  ;;  %v2336_v35 = vpop.permute.xlu1 %2335  ;;  %v2326_v36 = vpop.permute.xlu0 %2325  ;;  %v2170_v37 = vpack.c.bf16 %v883_v13, %v870_v26  ;;  %v1997_v22 = vld [vmem:[%s3180_s6 + $0x2] ss:$8 sm:$0x3] }
 0x2ef   : > { %v2328_v40 = vunpack.i.h.bf16 %v2326_v36  ;;  %v2327_v41 = vunpack.i.l.bf16 %v2326_v36  ;;  %v2338_v44 = vunpack.i.h.bf16 %v2336_v35  ;;  %v2337_v45 = vunpack.i.l.bf16 %v2336_v35 }
 0x2f0   : > { %2171 = vmatprep.subr.bf16.mxu1 %v2170_v37  ;;  %v1140_v35 = vrot.slane %v1997_v22, %v2769_v42  ;;  %v1144_v36 = vrot.slane %v1997_v22, %v2771_v43  ;;  %v1998_v37 = vld [vmem:[%s3180_s6 + $0x3] ss:$8 sm:$0x3] }
 0x2f1   : > { %v909_v47 = vsel %vm895_vm7, %v2303_v38, %v2327_v41  ;;  %2173 = vmatpush1.bf16.msra.mxu1 %v2172_v34  ;;  %v910_v49 = vsel %vm895_vm7, %v2327_v41, %v2328_v40  ;;  %v936_v58 = vsel %vm922_vm8, %v2308_v50, %v2337_v45  ;;  %v937_v29 = vsel %vm922_vm8, %v2337_v45, %v2338_v44  ;;  %v1999_v40 = vld [vmem:[%s3180_s6 + $0x4] ss:$8 sm:$0x3]  ;;  %v2000_v45 = vld [vmem:[%s3180_s6 + $0x5] ss:$8 sm:$0x3] }
 0x2f2   : > { %v2176_v51 = vpack.c.bf16 %v909_v47, %v896_v46  ;;  %v2341_v52 = vpop.permute.xlu1 %2340  ;;  %v2331_v53 = vpop.permute.xlu0 %2330  ;;  %v2174_v54 = vpack.c.bf16 %v910_v49, %v897_v48  ;;  %v1165_v38 = vrot.slane %v1998_v37, %v2769_v42  ;;  %v1169_v39 = vrot.slane %v1998_v37, %v2771_v43  ;;  %v2001_v48 = vld [vmem:[%s3180_s6 + $0x6] ss:$8 sm:$0x3] }
 0x2f3   : > { %v2333_v56 = vunpack.i.h.bf16 %v2331_v53  ;;  %v2332_v57 = vunpack.i.l.bf16 %v2331_v53  ;;  %v2343_v59 = vunpack.i.h.bf16 %v2341_v52  ;;  %v2342_v60 = vunpack.i.l.bf16 %v2341_v52 }
 0x2f4   : > { %2175 = vmatprep.subr.bf16.mxu1 %v2174_v54  ;;  %v1190_v41 = vrot.slane %v1999_v40, %v2769_v42  ;;  %v1194_v44 = vrot.slane %v1999_v40, %v2771_v43  ;;  %v1215_v46 = vrot.slane %v2000_v45, %v2769_v42  ;;  %v1219_v47 = vrot.slane %v2000_v45, %v2771_v43  ;;  %v2003_v54 = vld [vmem:[%s3180_s6 + $0x10] ss:$8 sm:$0x3] }
 0x2f5   : > { %v923_v25 = vsel %vm922_vm8, %v2307_v55, %v2332_v57  ;;  %2177 = vmatpush1.bf16.msra.mxu1 %v2176_v51  ;;  %v924_v27 = vsel %vm922_vm8, %v2332_v57, %v2333_v56  ;;  %v951_v9 = vsel %vm949_vm9, %v2342_v60, %v2343_v59  ;;  %v1241_v49 = vrot.slane %v2001_v48, %v2769_v42  ;;  %v2002_v51 = vld [vmem:[%s3180_s6 + $0x7] ss:$8 sm:$0x3]  ;;  %v1093_v59 = vld [vmem:[%s3180_s6] ss:$8 sm:$0x3] }
 0x2f6   : > { %v2180_v30 = vpack.c.bf16 %v936_v58, %v923_v25  ;;  %v2351_v61 = vpop.permute.xlu1 %2350  ;;  %v2346_v62 = vpop.permute.xlu0 %2345  ;;  %v2178_v63 = vpack.c.bf16 %v937_v29, %v924_v27  ;;  %v1245_v50 = vrot.slane %v2001_v48, %v2771_v43  ;;  %v1267_v52 = vrot.slane %v2002_v51, %v2769_v42 }
 0x2f7   : > { %v2353_v0 = vunpack.i.h.bf16 %v2351_v61  ;;  %v2352_v1 = vunpack.i.l.bf16 %v2351_v61  ;;  %v2348_v2 = vunpack.i.h.bf16 %v2346_v62  ;;  %v2347_v4 = vunpack.i.l.bf16 %v2346_v62 }
 0x2f8   : > { %2179 = vmatprep.subr.bf16.mxu1 %v2178_v63  ;;  %v1271_v53 = vrot.slane %v2002_v51, %v2771_v43  ;;  %v1293_v55 = vrot.slane %v2003_v54, %v2769_v42  ;;  %v1297_v56 = vrot.slane %v2003_v54, %v2771_v43  ;;  %v1102_v63 = vrot.slane %v1093_v59, %v2771_v43 }
 0x2f9   : > { %v950_v5 = vsel %vm949_vm9, %v2352_v1, %v2342_v60  ;;  %v963_v6 = vsel %vm949_vm9, %v2353_v0, %v2347_v4  ;;  %2181 = vmatpush1.bf16.msra.mxu1 %v2180_v30  ;;  %v964_v10 = vsel %vm949_vm9, %v2347_v4, %v2348_v2  ;;  %v1098_v1 = vrot.slane %v1093_v59, %v2769_v42 }
 0x2fa   : > { %v2184_v15 = vpack.c.bf16 %v963_v6, %v950_v5  ;;  %v2182_v11 = vpack.c.bf16 %v964_v10, %v951_v9 }
 0x2fc   : > { %2183 = vmatprep.subr.bf16.mxu1 %v2182_v11 }
 0x2fd   : > { %2185 = vmatpush1.bf16.msra.mxu1 %v2184_v15 }
 0x300   : > { %1994 = vmatmul.mubr.msk.f32.vlgmr.msra.gmra.mrb[2].mxu1 %vm981_vm10, %v967_v12 }
 0x301   : > { %1058 = vmatprep.mubr.f32.mxu1 %v2498_v8 }
 0x304   : > { %1995 = vmatmul.mubr.msk.f32.gmra.mrb[4].mxu1 %vm981_vm10, %v968_v16 }
 0x307   : > { %v974_v21 = vpop.permute.xlu0 %973  ;;  %v979_v32 = vpop.permute.xlu1 %978 }
 0x35c   : > { %v1121_v57 = vpop.permute.xlu1 %1120  ;;  %v1123_v58 = vpop.permute.xlu0 %1122 }
 0x35d   : > { %v1124_v25 = vsel %vm771_vm3, %v1121_v57, %v1123_v58  ;;  %vm2517_vm3 = vmmov 0  }
 0x3d3   : > { %v1054_v23 = vpop.f32.mrb[2].mxu1 }
 0x3d4   : > { %v1055_v24 = vadd.f32 %v1054_v23, %v974_v21  ;;  %v1056_v28 = vpop.f32.mrb[3].mxu1 }
 0x3d5   : > { %v1057_v31 = vadd.f32 %v1056_v28, %v974_v21 }
 0x3d6   : > { %2478 = vtanh.f32 %v1055_v24 }
 0x3d7   : > { %2480 = vtanh.f32 %v1057_v31  ;;  %v1060_v33 = vpop.f32.mrb[4].mxu1 }
 0x3d8   : > { %v1061_v3 = vadd.f32 %v1060_v33, %v979_v32  ;;  %v1062_v7 = vpop.f32.mrb[5].mxu1 }
 0x3d9   : > { %v1063_v13 = vadd.f32 %v1062_v7, %v979_v32 }
 0x3da   : > { %2482 = vtanh.f32 %v1061_v3 }
 0x3db   : > { %2484 = vtanh.f32 %v1063_v13 }
 0x3e0   : > { %v2479_v14 = vpop.eup %2478 }
 0x3e1   : > { %v2481_v19 = vpop.eup %2480  ;;  %1073 = vrot.lane.b32.xlu1 %v2479_v14, %s2502_s24 }
 0x3e2   : > { %1075 = vrot.lane.b32.xlu0 %v2481_v19, %s2502_s24 }
 0x3e4   : > { %v2483_v26 = vpop.eup %2482 }
 0x3e5   : > { %v2485_v34 = vpop.eup %2484  ;;  %1077 = vrot.lane.b32.xlu1 %v2483_v26, %s2502_s24 }
 0x3e6   : > { %1079 = vrot.lane.b32.xlu0 %v2485_v34, %s2502_s24 }
 0x3e9   : > { %1145 = vrot.lane.b32.xlu1 %v1140_v35, %s2500_s15 }
 0x3ea   : > { %1147 = vrot.lane.b32.xlu0 %v1144_v36, %s2500_s15 }
 0x3ed   : > { %1170 = vrot.lane.b32.xlu1 %v1165_v38, %s2501_s23 }
 0x3ee   : > { %1172 = vrot.lane.b32.xlu0 %v1169_v39, %s2501_s23 }
 0x3f1   : > { %1195 = vrot.lane.b32.xlu1 %v1190_v41, %s2502_s24 }
 0x3f2   : > { %1197 = vrot.lane.b32.xlu0 %v1194_v44, %s2502_s24 }
 0x3f5   : > { %1220 = vrot.lane.b32.xlu1 %v1215_v46, %s2508_s20 }
 0x3f6   : > { %1222 = vrot.lane.b32.xlu0 %v1219_v47, %s2508_s20  ;;  %s2515_s20 = smov 120  }
 0x3f9   : > { %1246 = vrot.lane.b32.xlu1 %v1241_v49, %s2509_s27 }
 0x3fa   : > { %1248 = vrot.lane.b32.xlu0 %v1245_v50, %s2509_s27 }
 0x3fd   : > { %1272 = vrot.lane.b32.xlu1 %v1267_v52, %s2510_s17 }
 0x3fe   : > { %1274 = vrot.lane.b32.xlu0 %v1271_v53, %s2510_s17 }
 0x401   : > { %1298 = vrot.lane.b32.xlu1 %v1293_v55, %s2511_s18 }
 0x402   : > { %1300 = vrot.lane.b32.xlu0 %v1297_v56, %s2511_s18 }
 0x453   : > { %v1074_v29 = vpop.permute.xlu1 %1073 }
 0x454   : > { %v1076_v60 = vpop.permute.xlu0 %1075  ;;  %v2957_v2 = vsel %vm848_vm5, 0.0, %v1074_v29 }
 0x455   : > { %v2947_v27 = vsel %vm848_vm5, %v1074_v29, %v1076_v60  ;;  %v2950_v30 = vsel %vm848_vm5, %v1076_v60, 0.0  ;;  %v1105_v11 = vmul.f32 %v1098_v1, %v2957_v2  ;;  %v1128_v26 = vmul.f32 %v1121_v57, %v2957_v2 }
 0x456   : > { %v1129_v61 = vmul.f32 %v1124_v25, %v2947_v27  ;;  %v1130_v62 = vmul.f32 %v1123_v58, %v2950_v30  ;;  %v1106_v43 = vmul.f32 %v1102_v63, %v2947_v27 }
 0x457   : > { %v1078_v0 = vpop.permute.xlu1 %1077 }
 0x458   : > { %v2960_v4 = vsel %vm848_vm5, 0.0, %v1078_v0  ;;  %v1080_v5 = vpop.permute.xlu0 %1079  ;;  %v2356_v6 = vpack.i.bf16 %v1130_v62, %v1129_v61 }
 0x459   : > { %v2963_v9 = vsel %vm848_vm5, %v1078_v0, %v1080_v5  ;;  %v1107_v10 = vmul.f32 %v1098_v1, %v2960_v4  ;;  %v1131_v7 = vmul.f32 %v1121_v57, %v2960_v4  ;;  %v2984_v35 = vsel %vm848_vm5, %v1080_v5, 0.0 }
 0x45a   : > { %2357 = vrot.lane.b32.xlu1 %v2356_v6, %s2503_s28  ;;  %v1108_v15 = vmul.f32 %v1102_v63, %v2963_v9  ;;  %v1132_v47 = vmul.f32 %v1124_v25, %v2963_v9  ;;  %v1133_v48 = vmul.f32 %v1123_v58, %v2984_v35 }
 0x45b   : > { %v1146_v42 = vpop.permute.xlu1 %1145  ;;  %v2188_v20 = vpack.c.bf16 %v1107_v10, %v1105_v11  ;;  %v2376_v38 = vpack.i.bf16 %v1131_v7, %v1128_v26 }
 0x45c   : > { %v1148_v12 = vpop.permute.xlu0 %1147  ;;  %v2186_v16 = vpack.c.bf16 %v1108_v15, %v1106_v43  ;;  %v1153_v36 = vmul.f32 %v1146_v42, %v2957_v2  ;;  %v1156_v39 = vmul.f32 %v1146_v42, %v2960_v4  ;;  %v2391_v29 = vpack.i.bf16 %v1133_v48, %v1132_v47  ;;  %v1525_v47 = vld [vmem:[%s3177_s3 + $0x8] sm:$0xff] }
 0x45d   : > { %v1149_v17 = vsel %vm721_vm2, %v1146_v42, %v1148_v12  ;;  %v1155_v18 = vmul.f32 %v1148_v12, %v2950_v30  ;;  %v1158_v54 = vmul.f32 %v1148_v12, %v2984_v35  ;;  %2004 = vmatprep.mubr.msk.f32.mxu1 %vm1528_vm14, %v1525_v47  ;;  %vm1515_vm2 = vcmask 982016  }
 0x45e   : > { %v1154_v21 = vmul.f32 %v1149_v17, %v2947_v27  ;;  %2187 = vmatprep.subr.bf16.mxu1 %v2186_v16  ;;  %v2381_v52 = vpack.i.bf16 %v1156_v39, %v1153_v36  ;;  %v1157_v53 = vmul.f32 %v1149_v17, %v2963_v9 }
 0x45f   : > { %2189 = vmatpush1.bf16.msra.mxu1 %v2188_v20  ;;  %v1171_v23 = vpop.permute.xlu1 %1170 }
 0x460   : > { %v1173_v24 = vpop.permute.xlu0 %1172  ;;  %v2361_v28 = vpack.i.bf16 %v1155_v18, %v1154_v21  ;;  %v1178_v40 = vmul.f32 %v1171_v23, %v2957_v2  ;;  %v1181_v41 = vmul.f32 %v1171_v23, %v2960_v4  ;;  %v2406_v25 = vpack.i.bf16 %v1158_v54, %v1157_v53  ;;  %v1772_v53 = vld [vmem:[%s3184_s10 + $0x28] sm:$0xff]  ;;  %v1832_v54 = vld [vmem:[%s3186_s12] sm:$0xf] }
 0x461   : > { %v1174_v31 = vsel %vm822_vm4, %v1171_v23, %v1173_v24  ;;  %v1180_v32 = vmul.f32 %v1173_v24, %v2950_v30  ;;  %v1183_v60 = vmul.f32 %v1173_v24, %v2984_v35  ;;  %vm1838_vm4 = vcmask 523264  }
 0x462   : > { %v1179_v33 = vmul.f32 %v1174_v31, %v2947_v27  ;;  %2362 = vrot.lane.b32.xlu0 %v2361_v28, %s2504_s29  ;;  %v2386_v51 = vpack.i.bf16 %v1181_v41, %v1178_v40  ;;  %v1182_v61 = vmul.f32 %v1174_v31, %v2963_v9 }
 0x463   : > { %v1196_v3 = vpop.permute.xlu1 %1195 }
 0x464   : > { %v1198_v13 = vpop.permute.xlu0 %1197  ;;  %v2366_v14 = vpack.i.bf16 %v1180_v32, %v1179_v33  ;;  %v1203_v55 = vmul.f32 %v1196_v3, %v2957_v2  ;;  %v1206_v56 = vmul.f32 %v1196_v3, %v2960_v4  ;;  %v2416_v11 = vpack.i.bf16 %v1183_v60, %v1182_v61 }
 0x465   : > { %v1199_v19 = vsel %vm848_vm5, %v1196_v3, %v1198_v13  ;;  %v1205_v22 = vmul.f32 %v1198_v13, %v2950_v30  ;;  %v1208_v43 = vmul.f32 %v1198_v13, %v2984_v35  ;;  %vm1912_vm5 = vcmask 60416  }
 0x466   : > { %v1204_v34 = vmul.f32 %v1199_v19, %v2947_v27  ;;  %2367 = vrot.lane.b32.xlu1 %v2366_v14, %s2505_s30  ;;  %v2396_v0 = vpack.i.bf16 %v1206_v56, %v1203_v55  ;;  %v1207_v10 = vmul.f32 %v1199_v19, %v2963_v9  ;;  %v1774_v55 = vld [vmem:[%s3184_s10 + $0x38] sm:$0xff] }
 0x467   : > { %v1221_v37 = vpop.permute.xlu1 %1220 }
 0x468   : > { %v1223_v44 = vpop.permute.xlu0 %1222  ;;  %v2371_v45 = vpack.i.bf16 %v1205_v22, %v1204_v34  ;;  %v1229_v62 = vmul.f32 %v1221_v37, %v2957_v2  ;;  %v1232_v63 = vmul.f32 %v1221_v37, %v2960_v4  ;;  %v2426_v18 = vpack.i.bf16 %v1208_v43, %v1207_v10 }
 0x469   : > { %v1225_v46 = vsel %vm1224_vm11, %v1221_v37, %v1223_v44  ;;  %v1231_v50 = vmul.f32 %v1223_v44, %v2950_v30  ;;  %v1234_v17 = vmul.f32 %v1223_v44, %v2984_v35 }
 0x46a   : > { %2377 = vrot.lane.b32.xlu1 %v2376_v38, %s2503_s28  ;;  %2372 = vrot.lane.b32.xlu0 %v2371_v45, %s2506_s16  ;;  %v1230_v49 = vmul.f32 %v1225_v46, %v2947_v27  ;;  %v2411_v12 = vpack.i.bf16 %v1232_v63, %v1229_v62  ;;  %v1233_v20 = vmul.f32 %v1225_v46, %v2963_v9 }
 0x46b   : > { %v1247_v57 = vpop.permute.xlu1 %1246 }
 0x46c   : > { %v1249_v58 = vpop.permute.xlu0 %1248  ;;  %v2401_v59 = vpack.i.bf16 %v1231_v50, %v1230_v49  ;;  %v1255_v28 = vmul.f32 %v1247_v57, %v2957_v2  ;;  %v1258_v31 = vmul.f32 %v1247_v57, %v2960_v4  ;;  %v2431_v3 = vpack.i.bf16 %v1234_v17, %v1233_v20 }
 0x46d   : > { %v1251_v1 = vsel %vm1250_vm12, %v1247_v57, %v1249_v58  ;;  %v1257_v42 = vmul.f32 %v1249_v58, %v2950_v30  ;;  %v1260_v33 = vmul.f32 %v1249_v58, %v2984_v35 }
 0x46e   : > { %2387 = vrot.lane.b32.xlu1 %v2386_v51, %s2505_s30  ;;  %2382 = vrot.lane.b32.xlu0 %v2381_v52, %s2504_s29  ;;  %v1256_v15 = vmul.f32 %v1251_v1, %v2947_v27  ;;  %v1259_v32 = vmul.f32 %v1251_v1, %v2963_v9  ;;  %v2436_v36 = vpack.i.bf16 %v1258_v31, %v1255_v28  ;;  %v1770_v51 = vld [vmem:[%s3184_s10 + $0x18] sm:$0xff]  ;;  %v1773_v52 = vld [vmem:[%s3184_s10 + $0x30] sm:$0xff] }
 0x46f   : > { %v1273_v5 = vpop.permute.xlu1 %1272 }
 0x470   : > { %v1275_v6 = vpop.permute.xlu0 %1274  ;;  %v2421_v24 = vpack.i.bf16 %v1257_v42, %v1256_v15  ;;  %v1281_v19 = vmul.f32 %v1273_v5, %v2957_v2  ;;  %v1284_v22 = vmul.f32 %v1273_v5, %v2960_v4  ;;  %v2446_v37 = vpack.i.bf16 %v1260_v33, %v1259_v32 }
 0x471   : > { %v1277_v16 = vsel %vm1276_vm13, %v1273_v5, %v1275_v6  ;;  %v1283_v23 = vmul.f32 %v1275_v6, %v2950_v30  ;;  %v1286_v34 = vmul.f32 %v1275_v6, %v2984_v35 }
 0x472   : > { %2392 = vrot.lane.b32.xlu0 %v2391_v29, %s2503_s28  ;;  %2402 = vrot.lane.b32.xlu1 %v2401_v59, %s2512_s14  ;;  %v1282_v21 = vmul.f32 %v1277_v16, %v2947_v27  ;;  %s2513_s28 = smov 122   ;;  %v1285_v26 = vmul.f32 %v1277_v16, %v2963_v9  ;;  %v2451_v40 = vpack.i.bf16 %v1284_v22, %v1281_v19 }
 0x473   : > { %v1299_v13 = vpop.permute.xlu1 %1298 }
 0x474   : > { %v2441_v7 = vpack.i.bf16 %v1283_v23, %v1282_v21  ;;  %v1301_v14 = vpop.permute.xlu0 %1300  ;;  %v2456_v39 = vpack.i.bf16 %v1286_v34, %v1285_v26  ;;  %v1306_v48 = vmul.f32 %v1299_v13, %v2957_v2  ;;  %v1309_v49 = vmul.f32 %v1299_v13, %v2960_v4  ;;  %v1768_v2 = vld [vmem:[%s3184_s10 + $0x8] sm:$0xff]  ;;  %v1771_v4 = vld [vmem:[%s3184_s10 + $0x20] sm:$0xff] }
 0x475   : > { %v1302_v38 = vsel %vm616_vm1, %v1299_v13, %v1301_v14  ;;  %v1308_v44 = vmul.f32 %v1301_v14, %v2950_v30  ;;  %v1311_v46 = vmul.f32 %v1301_v14, %v2984_v35  ;;  %v1767_v30 = vld [vmem:[%s3184_s10] sm:$0xff]  ;;  %v1769_v35 = vld [vmem:[%s3184_s10 + $0x10] sm:$0xff]  ;;  %vm1488_vm1 = vcmask 990208  }
 0x476   : > { %2397 = vrot.lane.b32.xlu0 %v2396_v0, %s2506_s16  ;;  %2407 = vrot.lane.b32.xlu1 %v2406_v25, %s2504_s29  ;;  %s2514_s29 = smov 121   ;;  %v1307_v41 = vmul.f32 %v1302_v38, %v2947_v27  ;;  %v1310_v45 = vmul.f32 %v1302_v38, %v2963_v9  ;;  %v2471_v9 = vpack.i.bf16 %v1309_v49, %v1306_v48 }
 0x478   : > { %v2466_v27 = vpack.i.bf16 %v1311_v46, %v1310_v45  ;;  %v2461_v50 = vpack.i.bf16 %v1308_v44, %v1307_v41 }
 0x47a   : > { %2417 = vrot.lane.b32.xlu0 %v2416_v11, %s2505_s30  ;;  %2412 = vrot.lane.b32.xlu1 %v2411_v12, %s2512_s14 }
 0x47e   : > { %2427 = vrot.lane.b32.xlu1 %v2426_v18, %s2506_s16  ;;  %2422 = vrot.lane.b32.xlu0 %v2421_v24, %s2513_s28  ;;  %s1988_s16 = sshll.u32 %s3191_s26, 2 }
 0x47f   : > { %s462_s22 = scalar_lea.vmem %s3187_s13, %s1988_s16 }
 0x482   : > { %2432 = vrot.lane.b32.xlu0 %v2431_v3, %s2512_s14  ;;  %2442 = vrot.lane.b32.xlu1 %v2441_v7, %s2514_s29 }
 0x486   : > { %2437 = vrot.lane.b32.xlu0 %v2436_v36, %s2513_s28  ;;  %2447 = vrot.lane.b32.xlu1 %v2446_v37, %s2513_s28 }
 0x48a   : > { %2457 = vrot.lane.b32.xlu0 %v2456_v39, %s2514_s29  ;;  %2452 = vrot.lane.b32.xlu1 %v2451_v40, %s2514_s29 }
 0x48e   : > { %2467 = vrot.lane.b32.xlu1 %v2466_v27, %s2515_s20  ;;  %2462 = vrot.lane.b32.xlu0 %v2461_v50, %s2515_s20 }
 0x492   : > { %1777 = vperm.xlu1 %2355, %v1767_v30   ;;  %2472 = vrot.lane.b32.xlu0 %v2471_v9, %s2515_s20 }
 0x496   : > { %1787 = vperm.xlu1 %2355, %v1769_v35   ;;  %1782 = vperm.xlu0 %2354, %v1768_v2  }
 0x49a   : > { %1797 = vperm.xlu1 %2355, %v1771_v4   ;;  %1792 = vperm.xlu0 %2354, %v1770_v51  }
 0x49e   : > { %1807 = vperm.xlu1 %2355, %v1773_v52   ;;  %1802 = vperm.xlu0 %2354, %v1772_v53  }
 0x4a2   : > { %1835 = vperm.xlu1 %2355, %v1832_v54   ;;  %1812 = vperm.xlu0 %2354, %v1774_v55  }
 0x4cc   : > { %v2358_v56 = vpop.permute.xlu1 %2357 }
 0x4cd   : > { %v2360_v61 = vunpack.i.h.bf16 %v2358_v56  ;;  %v2359_v62 = vunpack.i.l.bf16 %v2358_v56 }
 0x4cf   : > { %v1331_v42 = vsel %vm868_vm6, %v2359_v62, %v2360_v61 }
 0x4d4   : > { %v2363_v57 = vpop.permute.xlu0 %2362 }
 0x4d5   : > { %v2365_v43 = vunpack.i.h.bf16 %v2363_v57  ;;  %v2364_v15 = vunpack.i.l.bf16 %v2363_v57 }
 0x4d7   : > { %v1357_v3 = vsel %vm895_vm7, %v2364_v15, %v2365_v43 }
 0x4d8   : > { %v2368_v58 = vpop.permute.xlu1 %2367 }
 0x4d9   : > { %v2370_v32 = vunpack.i.h.bf16 %v2368_v58  ;;  %v2369_v33 = vunpack.i.l.bf16 %v2368_v58 }
 0x4db   : > { %v1383_v44 = vsel %vm922_vm8, %v2369_v33, %v2370_v32 }
 0x4dc   : > { %v3068_v29 = vpop.permute.xlu0 %2372  ;;  %v2378_v59 = vpop.permute.xlu1 %2377 }
 0x4dd   : > { %v2379_v63 = vunpack.i.l.bf16 %v2378_v59  ;;  %v2380_v5 = vunpack.i.h.bf16 %v2378_v59  ;;  %v2375_v40 = vunpack.i.h.bf16 %v3068_v29  ;;  %v2374_v41 = vunpack.i.l.bf16 %v3068_v29 }
 0x4df   : > { %v1330_v11 = vsel %vm868_vm6, %v2379_v63, %v2359_v62  ;;  %v1409_v52 = vsel %vm949_vm9, %v2374_v41, %v2375_v40 }
 0x4e0   : > { %v2383_v60 = vpop.permute.xlu0 %2382  ;;  %v2388_v25 = vpop.permute.xlu1 %2387 }
 0x4e1   : > { %v2384_v12 = vunpack.i.l.bf16 %v2383_v60  ;;  %v2385_v24 = vunpack.i.h.bf16 %v2383_v60  ;;  %v2389_v13 = vunpack.i.l.bf16 %v2388_v25  ;;  %v2390_v37 = vunpack.i.h.bf16 %v2388_v25 }
 0x4e3   : > { %v1356_v7 = vsel %vm895_vm7, %v2384_v12, %v2364_v15  ;;  %v1382_v45 = vsel %vm922_vm8, %v2389_v13, %v2369_v33 }
 0x4e4   : > { %v2393_v0 = vpop.permute.xlu0 %2392  ;;  %v3070_v1 = vpop.permute.xlu1 %2402 }
 0x4e5   : > { %v2395_v6 = vunpack.i.h.bf16 %v2393_v0  ;;  %v2394_v10 = vunpack.i.l.bf16 %v2393_v0  ;;  %v2405_v4 = vunpack.i.h.bf16 %v3070_v1  ;;  %v2404_v51 = vunpack.i.l.bf16 %v3070_v1 }
 0x4e7   : > { %v1332_v16 = vsel %vm868_vm6, %v2380_v5, %v2394_v10  ;;  %v1333_v17 = vsel %vm868_vm6, %v2394_v10, %v2395_v6  ;;  %v1436_v5 = vsel %vm1434_vm15, %v2404_v51, %v2405_v4  ;;  %v1524_v4 = vld [vmem:[%s3177_s3] sm:$0xff] }
 0x4e8   : > { %v2192_v18 = vpack.c.bf16 %v1332_v16, %v1330_v11  ;;  %v2398_v20 = vpop.permute.xlu0 %2397  ;;  %v2408_v21 = vpop.permute.xlu1 %2407  ;;  %v2190_v23 = vpack.c.bf16 %v1333_v17, %v1331_v42 }
 0x4e9   : > { %v2410_v28 = vunpack.i.h.bf16 %v2408_v21  ;;  %v2409_v31 = vunpack.i.l.bf16 %v2408_v21  ;;  %v2399_v46 = vunpack.i.l.bf16 %v2398_v20  ;;  %v2400_v9 = vunpack.i.h.bf16 %v2398_v20 }
 0x4ea   : > { %2191 = vmatprep.subr.bf16.mxu1 %v2190_v23 }
 0x4eb   : > { %v1358_v14 = vsel %vm895_vm7, %v2385_v24, %v2409_v31  ;;  %2193 = vmatpush1.bf16.msra.mxu1 %v2192_v18  ;;  %v1359_v19 = vsel %vm895_vm7, %v2409_v31, %v2410_v28  ;;  %v1408_v53 = vsel %vm949_vm9, %v2399_v46, %v2374_v41 }
 0x4ec   : > { %v2196_v22 = vpack.c.bf16 %v1358_v14, %v1356_v7  ;;  %v2418_v26 = vpop.permute.xlu0 %2417  ;;  %v2413_v34 = vpop.permute.xlu1 %2412  ;;  %v2194_v36 = vpack.c.bf16 %v1359_v19, %v1357_v3 }
 0x4ed   : > { %v2420_v38 = vunpack.i.h.bf16 %v2418_v26  ;;  %v2419_v39 = vunpack.i.l.bf16 %v2418_v26  ;;  %v2414_v54 = vunpack.i.l.bf16 %v2413_v34  ;;  %v2415_v60 = vunpack.i.h.bf16 %v2413_v34 }
 0x4ee   : > { %2195 = vmatprep.subr.bf16.mxu1 %v2194_v36 }
 0x4ef   : > { %v1384_v47 = vsel %vm922_vm8, %v2390_v37, %v2419_v39  ;;  %2197 = vmatpush1.bf16.msra.mxu1 %v2196_v22  ;;  %v1385_v48 = vsel %vm922_vm8, %v2419_v39, %v2420_v38  ;;  %v1435_v0 = vsel %vm1434_vm15, %v2414_v54, %v2404_v51  ;;  %v1527_v51 = vld [vmem:[%s3177_s3 + $0x18] sm:$0xff] }
 0x4f0   : > { %v2200_v49 = vpack.c.bf16 %v1384_v47, %v1382_v45  ;;  %v2423_v27 = vpop.permute.xlu0 %2422  ;;  %v2428_v50 = vpop.permute.xlu1 %2427  ;;  %v2198_v30 = vpack.c.bf16 %v1385_v48, %v1383_v44 }
 0x4f1   : > { %v2430_v35 = vunpack.i.h.bf16 %v2428_v50  ;;  %v2429_v2 = vunpack.i.l.bf16 %v2428_v50  ;;  %v2425_v62 = vunpack.i.h.bf16 %v2423_v27  ;;  %v2424_v63 = vunpack.i.l.bf16 %v2423_v27 }
 0x4f2   : > { %2199 = vmatprep.subr.bf16.mxu1 %v2198_v30 }
 0x4f3   : > { %v1410_v55 = vsel %vm949_vm9, %v2400_v9, %v2429_v2  ;;  %2201 = vmatpush1.bf16.msra.mxu1 %v2200_v49  ;;  %v1411_v56 = vsel %vm949_vm9, %v2429_v2, %v2430_v35  ;;  %v1463_v20 = vsel %vm1461_vm0, %v2424_v63, %v2425_v62 }
 0x4f4   : > { %v2204_v57 = vpack.c.bf16 %v1410_v55, %v1408_v53  ;;  %v2433_v58 = vpop.permute.xlu0 %2432  ;;  %v2443_v29 = vpop.permute.xlu1 %2442  ;;  %v2202_v59 = vpack.c.bf16 %v1411_v56, %v1409_v52  ;;  %v1526_v52 = vld [vmem:[%s3177_s3 + $0x10] sm:$0xff]  ;;  %v1613_v53 = vld [vmem:[%s3183_s9 + $0x8] sm:$0xff]  ;;  %v1612_v55 = vld [vmem:[%s3183_s9] sm:$0xff] }
 0x4f5   : > { %v2435_v25 = vunpack.i.h.bf16 %v2433_v58  ;;  %v2434_v61 = vunpack.i.l.bf16 %v2433_v58  ;;  %v2445_v18 = vunpack.i.h.bf16 %v2443_v29  ;;  %v2444_v21 = vunpack.i.l.bf16 %v2443_v29  ;;  %v1615_v29 = vld [vmem:[%s3183_s9 + $0x18] sm:$0xff] }
 0x4f6   : > { %2203 = vmatprep.subr.bf16.mxu1 %v2202_v59 }
 0x4f7   : > { %v1437_v1 = vsel %vm1434_vm15, %v2415_v60, %v2434_v61  ;;  %2205 = vmatpush1.bf16.msra.mxu1 %v2204_v57  ;;  %v1438_v6 = vsel %vm1434_vm15, %v2434_v61, %v2435_v25  ;;  %v1490_v34 = vsel %vm1488_vm1, %v2444_v21, %v2445_v18  ;;  %v1614_v60 = vld [vmem:[%s3183_s9 + $0x10] sm:$0xff]  ;;  %v1617_v61 = vld [vmem:[%s3183_s9 + $0x28] sm:$0xff] }
 0x4f8   : > { %v2208_v10 = vpack.c.bf16 %v1437_v1, %v1435_v0  ;;  %v2438_v43 = vpop.permute.xlu0 %2437  ;;  %v2448_v15 = vpop.permute.xlu1 %2447  ;;  %v2206_v42 = vpack.c.bf16 %v1438_v6, %v1436_v5  ;;  %v1616_v1 = vld [vmem:[%s3183_s9 + $0x20] sm:$0xff]  ;;  %v1619_v5 = vld [vmem:[%s3183_s9 + $0x38] sm:$0xff] }
 0x4f9   : > { %v2440_v11 = vunpack.i.h.bf16 %v2438_v43  ;;  %v2439_v12 = vunpack.i.l.bf16 %v2438_v43  ;;  %v2450_v16 = vunpack.i.h.bf16 %v2448_v15  ;;  %v2449_v17 = vunpack.i.l.bf16 %v2448_v15  ;;  %v1618_v43 = vld [vmem:[%s3183_s9 + $0x30] sm:$0xff]  ;;  %v1621_v15 = vld [vmem:[%s3183_s9 + $0x48] sm:$0xff] }
 0x4fa   : > { %2207 = vmatprep.subr.bf16.mxu1 %v2206_v42 }
 0x4fb   : > { %v1462_v23 = vsel %vm1461_vm0, %v2439_v12, %v2424_v63  ;;  %v1464_v24 = vsel %vm1461_vm0, %v2440_v11, %v2449_v17  ;;  %2209 = vmatpush1.bf16.msra.mxu1 %v2208_v10  ;;  %v1465_v28 = vsel %vm1461_vm0, %v2449_v17, %v2450_v16  ;;  %v1620_v12 = vld [vmem:[%s3183_s9 + $0x40] sm:$0xff]  ;;  %v1623_v16 = vld [vmem:[%s3183_s9 + $0x58] sm:$0xff] }
 0x4fc   : > { %v2212_v31 = vpack.c.bf16 %v1464_v24, %v1462_v23  ;;  %v2458_v32 = vpop.permute.xlu0 %2457  ;;  %v2453_v33 = vpop.permute.xlu1 %2452  ;;  %v2210_v3 = vpack.c.bf16 %v1465_v28, %v1463_v20  ;;  %v1622_v20 = vld [vmem:[%s3183_s9 + $0x50] sm:$0xff]  ;;  %v1624_v28 = vld [vmem:[%s3183_s9 + $0x60] sm:$0xff] }
 0x4fd   : > { %v2460_v7 = vunpack.i.h.bf16 %v2458_v32  ;;  %v2459_v13 = vunpack.i.l.bf16 %v2458_v32  ;;  %v2455_v14 = vunpack.i.h.bf16 %v2453_v33  ;;  %v2454_v19 = vunpack.i.l.bf16 %v2453_v33 }
 0x4fe   : > { %2211 = vmatprep.subr.bf16.mxu1 %v2210_v3  ;;  %v1626_v3 = vld [vmem:[%s3183_s9 + $0x70] sm:$0xff] }
 0x4ff   : > { %v1491_v22 = vsel %vm1488_vm1, %v2455_v14, %v2459_v13  ;;  %v1489_v26 = vsel %vm1488_vm1, %v2454_v19, %v2444_v21  ;;  %2213 = vmatpush1.bf16.msra.mxu1 %v2212_v31  ;;  %v1492_v36 = vsel %vm1488_vm1, %v2459_v13, %v2460_v7  ;;  %v1625_v21 = vld [vmem:[%s3183_s9 + $0x68] sm:$0xff]  ;;  %v1627_v31 = vld [vmem:[%s3183_s9 + $0x78] sm:$0xff] }
 0x500   : > { %v2216_v37 = vpack.c.bf16 %v1491_v22, %v1489_v26  ;;  %v2463_v38 = vpop.permute.xlu0 %2462  ;;  %v2468_v39 = vpop.permute.xlu1 %2467  ;;  %v2214_v40 = vpack.c.bf16 %v1492_v36, %v1490_v34  ;;  %v2516_v26 = vmov 0.0|0.0  }
 0x501   : > { %v2465_v41 = vunpack.i.h.bf16 %v2463_v38  ;;  %v2464_v44 = vunpack.i.l.bf16 %v2463_v38  ;;  %v2470_v45 = vunpack.i.h.bf16 %v2468_v39  ;;  %v2469_v46 = vunpack.i.l.bf16 %v2468_v39 }
 0x502   : > { %2215 = vmatprep.subr.bf16.mxu1 %v2214_v40 }
 0x503   : > { %2217 = vmatpush1.bf16.msra.mxu1 %v2216_v37  ;;  %v1517_v47 = vsel %vm1515_vm2, %v2464_v44, %v2465_v41  ;;  %v1519_v48 = vsel %vm1515_vm2, %v2469_v46, %v2470_v45 }
 0x504   : > { %v2473_v49 = vpop.permute.xlu0 %2472  ;;  %v2218_v27 = vpack.c.bf16 %v1519_v48, %v1517_v47 }
 0x505   : > { %v2475_v50 = vunpack.i.h.bf16 %v2473_v49  ;;  %v2474_v30 = vunpack.i.l.bf16 %v2473_v49 }
 0x506   : > { %2219 = vmatprep.subr.bf16.mxu1 %v2218_v27 }
 0x507   : > { %v1516_v9 = vsel %vm1515_vm2, %v2474_v30, %v2464_v44  ;;  %v1518_v35 = vsel %vm1515_vm2, %v2475_v50, %v2469_v46 }
 0x508   : > { %v2220_v2 = vpack.c.bf16 %v1518_v35, %v1516_v9 }
 0x50a   : > { %2221 = vmatpush1.bf16.msra.mxu1 %v2220_v2 }
 0x50b   : > { %2254 = vmatprep.subr.bf16.mxu1 %v2516_v26 }
 0x50d   : > { %1600 = vmatmul.mubr.f32.vlgmr.msra.gmra.mrb[6].mxu1 %v1524_v4 }
 0x50e   : > { %2005 = vmatprep.mubr.msk.f32.mxu1 %vm1528_vm14, %v1527_v51 }
 0x511   : > { %1606 = vmatmul.mubr.f32.gmra.mrb[8].mxu1 %v1526_v52  ;;  %v1778_v51 = vpop.permute.xlu1 %1777 }
 0x512   : > { %2131 = vmatprep.mubr.msk.f32.mxu1 %vm2517_vm3, %v2498_v8 }
 0x5e0   : > { %v1601_v54 = vpop.f32.mrb[6].mxu1 }
 0x5e1   : > { %v1603_v56 = vpop.f32.mrb[7].mxu1  ;;  %v1628_v58 = vmul.f32 %v1612_v55, %v1601_v54  ;;  %v1632_v6 = vmul.f32 %v1616_v1, %v1601_v54  ;;  %v1636_v17 = vmul.f32 %v1620_v12, %v1601_v54  ;;  %v1640_v32 = vmul.f32 %v1624_v28, %v1601_v54  ;;  %v1783_v55 = vpop.permute.xlu0 %1782 }
 0x5e2   : > { %v1629_v57 = vmul.f32 %v1613_v53, %v1603_v56  ;;  %v1633_v0 = vmul.f32 %v1617_v61, %v1603_v56  ;;  %v1637_v11 = vmul.f32 %v1621_v15, %v1603_v56  ;;  %v1641_v24 = vmul.f32 %v1625_v21, %v1603_v56 }
 0x5e3   : > { %v1645_v13 = vmul.f32 %v1603_v56, %v1603_v56  ;;  %v1644_v14 = vmul.f32 %v1601_v54, %v1601_v54 }
 0x5e4   : > { %v1607_v59 = vpop.f32.mrb[8].mxu1  ;;  %1712 = vmatprep.mubr.f32.mxu0 %v1629_v57 }
 0x5e5   : > { %v1609_v25 = vpop.f32.mrb[9].mxu1  ;;  %1713 = vmatmul.mubr.f32.vlgmr.msra.gmra.mrb[2].mxu0 %v1628_v58  ;;  %v1630_v63 = vmul.f32 %v1614_v60, %v1607_v59  ;;  %v1634_v42 = vmul.f32 %v1618_v43, %v1607_v59  ;;  %v1638_v23 = vmul.f32 %v1622_v20, %v1607_v59  ;;  %v1642_v7 = vmul.f32 %v1626_v3, %v1607_v59  ;;  %v1788_v58 = vpop.permute.xlu1 %1787 }
 0x5e6   : > { %v1631_v62 = vmul.f32 %v1615_v29, %v1609_v25  ;;  %v1635_v10 = vmul.f32 %v1619_v5, %v1609_v25  ;;  %v1639_v18 = vmul.f32 %v1623_v16, %v1609_v25  ;;  %v1643_v33 = vmul.f32 %v1627_v31, %v1609_v25  ;;  %v1793_v61 = vpop.permute.xlu0 %1792 }
 0x5e7   : > { %v1647_v19 = vmul.f32 %v1609_v25, %v1609_v25  ;;  %v1646_v22 = vmul.f32 %v1607_v59, %v1607_v59 }
 0x5e8   : > { %1717 = vmatprep.mubr.f32.mxu0 %v1631_v62 }
 0x5e9   : > { %1718 = vmatmul.mubr.f32.gmra.mrb[4].mxu0 %v1630_v63  ;;  %v1798_v63 = vpop.permute.xlu1 %1797 }
 0x5ea   : > { %1722 = vmatprep.mubr.f32.mxu0 %v1633_v0  ;;  %v1803_v1 = vpop.permute.xlu0 %1802 }
 0x5ed   : > { %1723 = vmatmul.mubr.f32.gmra.mrb[6].mxu0 %v1632_v6  ;;  %v1808_v5 = vpop.permute.xlu1 %1807 }
 0x5ee   : > { %1727 = vmatprep.mubr.f32.mxu0 %v1635_v10 }
 0x5f1   : > { %1728 = vmatmul.mubr.f32.gmra.mrb[8].mxu0 %v1634_v42 }
 0x5f2   : > { %1732 = vmatprep.mubr.f32.mxu0 %v1637_v11 }
 0x5f5   : > { %1733 = vmatmul.mubr.f32.gmra.mrb[10].mxu0 %v1636_v17 }
 0x5f6   : > { %1737 = vmatprep.mubr.f32.mxu0 %v1639_v18  ;;  %v1813_v18 = vpop.permute.xlu0 %1812 }
 0x5f9   : > { %1738 = vmatmul.mubr.f32.gmra.mrb[12].mxu0 %v1638_v23 }
 0x5fa   : > { %1742 = vmatprep.mubr.f32.mxu0 %v1641_v24 }
 0x5fd   : > { %1743 = vmatmul.mubr.f32.gmra.mrb[14].mxu0 %v1640_v32 }
 0x5fe   : > { %1747 = vmatprep.mubr.f32.mxu0 %v1643_v33 }
 0x601   : > { %1748 = vmatmul.mubr.f32.gmra.mrb[16].mxu0 %v1642_v7 }
 0x602   : > { %1752 = vmatprep.mubr.f32.mxu0 %v1645_v13 }
 0x605   : > { %1753 = vmatmul.mubr.f32.gmra.mrb[18].mxu0 %v1644_v14 }
 0x606   : > { %1757 = vmatprep.mubr.f32.mxu0 %v1647_v19 }
 0x609   : > { %1758 = vmatmul.mubr.f32.gmra.mrb[20].mxu0 %v1646_v22  ;;  %v1831_v22 = vld [vmem:[%s3185_s11] sm:$0xf] }
 0x6b8   : > { %v2076_v34 = vpop.f32.mrb[2].mxu0 }
 0x6b9   : > { %v2077_v36 = vpop.f32.mrb[3].mxu0 }
 0x6ba   : > { %v2078_v37 = vadd.f32 %v2077_v36, %v2076_v34  ;;  %v1836_v34 = vpop.permute.xlu1 %1835 }
 0x6bc   : > { %v2079_v38 = vpop.f32.mrb[4].mxu0  ;;  %v1815_v6 = vmul.f32 %v2078_v37, %v1778_v51 }
 0x6bd   : > { %v2080_v39 = vpop.f32.mrb[5].mxu0 }
 0x6be   : > { %v2081_v40 = vadd.f32 %v2080_v39, %v2079_v38 }
 0x6c0   : > { %v2082_v41 = vpop.f32.mrb[6].mxu0  ;;  %v1816_v20 = vmul.f32 %v2081_v40, %v1783_v55 }
 0x6c1   : > { %v2083_v44 = vpop.f32.mrb[7].mxu0 }
 0x6c2   : > { %v2084_v45 = vadd.f32 %v2083_v44, %v2082_v41 }
 0x6c4   : > { %v2085_v46 = vpop.f32.mrb[8].mxu0  ;;  %v1817_v10 = vmul.f32 %v2084_v45, %v1788_v58 }
 0x6c5   : > { %v2086_v47 = vpop.f32.mrb[9].mxu0 }
 0x6c6   : > { %v2087_v48 = vadd.f32 %v2086_v47, %v2085_v46 }
 0x6c8   : > { %v2088_v49 = vpop.f32.mrb[10].mxu0  ;;  %v1818_v21 = vmul.f32 %v2087_v48, %v1793_v61 }
 0x6c9   : > { %v2089_v27 = vpop.f32.mrb[11].mxu0 }
 0x6ca   : > { %v2090_v50 = vadd.f32 %v2089_v27, %v2088_v49 }
 0x6cc   : > { %v2091_v30 = vpop.f32.mrb[12].mxu0  ;;  %v1819_v43 = vmul.f32 %v2090_v50, %v1798_v63 }
 0x6cd   : > { %v2092_v9 = vpop.f32.mrb[13].mxu0 }
 0x6ce   : > { %v2093_v35 = vadd.f32 %v2092_v9, %v2091_v30 }
 0x6d0   : > { %v2094_v2 = vpop.f32.mrb[14].mxu0  ;;  %v1820_v23 = vmul.f32 %v2093_v35, %v1803_v1 }
 0x6d1   : > { %v2095_v8 = vpop.f32.mrb[15].mxu0 }
 0x6d2   : > { %v2096_v4 = vadd.f32 %v2095_v8, %v2094_v2 }
 0x6d4   : > { %v2097_v52 = vpop.f32.mrb[16].mxu0  ;;  %v1821_v15 = vmul.f32 %v2096_v4, %v1808_v5 }
 0x6d5   : > { %v2098_v53 = vpop.f32.mrb[17].mxu0 }
 0x6d6   : > { %v2099_v54 = vadd.f32 %v2098_v53, %v2097_v52 }
 0x6d8   : > { %v2100_v56 = vpop.f32.mrb[18].mxu0  ;;  %v1822_v24 = vmul.f32 %v2099_v54, %v1813_v18 }
 0x6d9   : > { %v2101_v57 = vpop.f32.mrb[19].mxu0 }
 0x6da   : > { %v2102_v29 = vadd.f32 %v2101_v57, %v2100_v56 }
 0x6dc   : > { %v1763_v59 = vmax.f32 %v2102_v29, 1e-16  ;;  %v2103_v60 = vpop.f32.mrb[20].mxu0 }
 0x6dd   : > { %v2104_v25 = vpop.f32.mrb[21].mxu0 }
 0x6de   : > { %2486 = vrsqrt.f32 %v1763_v59  ;;  %v2105_v62 = vadd.f32 %v2104_v25, %v2103_v60 }
 0x6e0   : > { %v1764_v0 = vmax.f32 %v2105_v62, 1e-16 }
 0x6e2   : > { %2488 = vrsqrt.f32 %v1764_v0 }
 0x6e8   : > { %v2487_v42 = vpop.eup %2486 }
 0x6e9   : > { %v1823_v11 = vmul.f32 %v2487_v42, %v1815_v6  ;;  %v1825_v12 = vmul.f32 %v2487_v42, %v1817_v10  ;;  %v1827_v16 = vmul.f32 %v2487_v42, %v1819_v43  ;;  %v1829_v17 = vmul.f32 %v2487_v42, %v1821_v15 }
 0x6ec   : > { %v2489_v28 = vpop.eup %2488 }
 0x6ed   : > { %v1824_v31 = vmul.f32 %v2489_v28, %v1816_v20  ;;  %v1826_v32 = vmul.f32 %v2489_v28, %v1818_v21  ;;  %v1828_v33 = vmul.f32 %v2489_v28, %v1820_v23  ;;  %v1830_v3 = vmul.f32 %v2489_v28, %v1822_v24 }
 0x6ef   : > { %v2255_v7 = vpack.c.bf16 %v1824_v31, %v1823_v11  ;;  %v2258_v13 = vpack.c.bf16 %v1826_v32, %v1825_v12  ;;  %v2261_v14 = vpack.c.bf16 %v1828_v33, %v1827_v16  ;;  %v2264_v19 = vpack.c.bf16 %v1830_v3, %v1829_v17 }
 0x6f1   : > { %2256 = vmatpush3.bf16.msra.mxu1 %v2255_v7 }
 0x6f2   : > { %2257 = vmatprep.subr.bf16.mxu1 %v2516_v26 }
 0x6f5   : > { %2259 = vmatpush3.bf16.msra.mxu1 %v2258_v13 }
 0x6f6   : > { %2260 = vmatprep.subr.bf16.mxu1 %v2516_v26 }
 0x6f9   : > { %2262 = vmatpush3.bf16.msra.mxu1 %v2261_v14 }
 0x6fa   : > { %2263 = vmatprep.subr.bf16.mxu1 %v2516_v26 }
 0x6fd   : > { %2265 = vmatpush3.bf16.msra.mxu1 %v2264_v19 }
 0x700   : > { %2132 = vmatmul.mubr.msk.f32.vlgmr.msra.gmra.mrb[10].mxu1 %vm1838_vm4, %v1831_v22 }
 0x7d3   : > { %v1908_v36 = vpop.f32.mrb[10].mxu1 }
 0x7d4   : > { %v1909_v37 = vadd.f32 %v1908_v36, %v1836_v34  ;;  %v2133_v38 = vpop.f32.mrb[11].mxu1 }
 0x7d6   : > { %1913 = vst.msk [vmem:[%s462_s22] sm:$0xf] %vm1912_vm5, %v1909_v37 }
 0x7d7 PF: > { %s23_s25 = sadd.s32 1, %s2496_s25  }
 0x7d8   : > { %p20_p5 = scmp.ge.s32.totalorder %s23_s25, 4  }
 0x7da   :  { %22 = sbr.rel (!%p20_p5) target bundleno = 1 (0x1), region = 117 }

</bundles_post_ra>
